<compile_context>
chip_gen: v7x
topology: tpu7x:2x2x1
jax: 0.10.0
libtpu: 0.0.40
codegen_flags: <defaults>
</compile_context>

<pallas_src>
import functools

import jax
import jax.numpy as jnp
from jax.experimental import pallas as pl
from jax.experimental.pallas import tpu as pltpu


# ---------------------------------------------------------------------------
# Model hyper-parameters (mirrors PVCNNEncoder.__init__ defaults, small N)
# ---------------------------------------------------------------------------
IN_FEATURES = 3            # xyz
OUT_FEATURES = 32          # latent size
N_POINTS = 128             # small, lane-friendly point count
SCALE_CHANNELS = 0.25
_BASE_BLOCK_CHANNELS = (64, 128, 256, 512)
BLOCK_CHANNELS = tuple(int(SCALE_CHANNELS * c) for c in _BASE_BLOCK_CHANNELS)
C1, C2, C3, C4 = BLOCK_CHANNELS                      # (16, 32, 64, 128)
PVCNN_OUT_CHANNELS = C4                              # 128
DOWNSCALE_CHANNELS = PVCNN_OUT_CHANNELS // 2         # 64
OUT_CONV_CHANNELS = 1                                # out_channels=1


# ---------------------------------------------------------------------------
# Pallas kernel: one batch tile (bt batch elements == bt*N point-lanes) / step
# ---------------------------------------------------------------------------
def _make_kernel(bt):
    n = N_POINTS

    def kernel(x_ref,
               w1_ref, b1_ref, w2_ref, b2_ref, w3_ref, b3_ref, w4_ref, b4_ref,
               a_ref, wlt_ref, bleff_ref,
               out_ref, p_sc):
        # x_ref: (3, bt*N)  -- channels on sublanes, points on lanes (dense).
        x = x_ref[...]

        def layer(w_ref, b_ref, h):
            # one wide MXU matmul W (Cout, Cin) @ H (Cin, bt*N)
            y = jnp.dot(w_ref[...], h, preferred_element_type=jnp.float32)
            return jnp.maximum(y + b_ref[...], 0.0)     # lane-dense bias+ReLU

        h = layer(w1_ref, b1_ref, x)                     # (C1, bt*N)  K=3 on MXU
        h = layer(w2_ref, b2_ref, h)                     # (C2, bt*N)
        h = layer(w3_ref, b3_ref, h)                     # (C3, bt*N)
        h = layer(w4_ref, b4_ref, h)                     # (C4, bt*N)

        # Folded tail: per-point scalar p = <A, h4[:, point]>
        #   VPU multiply + XLU sublane reduce over C4 (MXU stays free).
        pa = jnp.sum(h * a_ref[...], axis=0, keepdims=True)   # (1, bt*N)

        # Lay p out as (bt, N): bt aligned (1,128) stores into a tiny scratch
        # (robust stand-in for a lane->sublane reshape).
        for b in range(bt):
            p_sc[b:b + 1, :] = pa[:, b * n:(b + 1) * n]

        # One well-shaped MXU matmul: (bt, N) @ (N, OUT_FEATURES)
        y = jnp.dot(p_sc[...], wlt_ref[...], preferred_element_type=jnp.float32)
        out_ref[...] = y + bleff_ref[...]

    return kernel


# ---------------------------------------------------------------------------
# Wrapper
# ---------------------------------------------------------------------------
@functools.partial(jax.jit, static_argnames=("block_batch",))
def pvcnn_encoder_forward(points, params, block_batch=32):
    """points: [B, N, 3] float32  ->  latents: [B, OUT_FEATURES] float32."""
    B, N, C = points.shape
    assert C == IN_FEATURES and N == N_POINTS
    bt = min(block_batch, B)
    assert B % bt == 0, "batch must be divisible by the batch tile"
    assert bt == B or bt % 8 == 0, "batch tile must be a multiple of 8 (or ==B)"
    num_tiles = B // bt

    (w1, b1, w2, b2, w3, b3, w4, b4, wd, bd, wo, bo, wl, bl) = params

    # ---- host-side folding of the activation-free tail (tiny, one-off) -----
    # conv_downscale -> out_layer Conv1d  folds to  A = wo @ wd,  be = wo@bd+bo
    a_col = jnp.dot(wo, wd).T                            # (C4, 1)
    be = jnp.dot(wo, bd) + bo                            # (1, 1)
    wl_t = wl.T                                          # (N, OUT_FEATURES)
    bl_eff = bl + be * jnp.sum(wl_t, axis=0, keepdims=True)   # (1, OUT_FEATURES)

    kparams = (w1, b1, w2, b2, w3, b3, w4, b4, a_col, wl_t, bl_eff)

    # Pack input dense: channels on sublanes, points on lanes -> [3, B*N]
    x_t = points.reshape(B * N, IN_FEATURES).T           # (3, B*N)

    def full_spec(arr):
        # whole (small) parameter array resident in VMEM every grid step
        return pl.BlockSpec(arr.shape, lambda i: (0,) * arr.ndim)

    in_specs = [pl.BlockSpec((IN_FEATURES, bt * N), lambda i: (0, i))]
    in_specs += [full_spec(p) for p in kparams]

    # VMEM per step (bt=32, f32): x tile 128 KiB, params < 0.5 MiB,
    # intermediates ~3.8 MiB, scratch 16 KiB -> well under the 16 MiB default
    # scoped VMEM on v5e (and 32 MiB on v6e/v7x); no explicit limit needed.
    out = pl.pallas_call(
        _make_kernel(bt),
        out_shape=jax.ShapeDtypeStruct((B, OUT_FEATURES), jnp.float32),
        grid_spec=pltpu.PrefetchScalarGridSpec(
            num_scalar_prefetch=0,
            grid=(num_tiles,),
            in_specs=in_specs,
            out_specs=pl.BlockSpec((bt, OUT_FEATURES), lambda i: (i, 0)),
            scratch_shapes=[pltpu.VMEM((bt, N_POINTS), jnp.float32)],
        ),
        compiler_params=pltpu.CompilerParams(
            dimension_semantics=("parallel",)),
    )(x_t, *kparams)

    return out                                           # (B, OUT_FEATURES)


# ---------------------------------------------------------------------------
# Deterministic synthetic parameters (PyTorch-like layout)
# ---------------------------------------------------------------------------
def init_params(key):
    def dense(key, cout, cin, scale=0.05):
        kw, kb = jax.random.split(key)
        w = scale * jax.random.normal(kw, (cout, cin), dtype=jnp.float32)
        b = scale * jax.random.normal(kb, (cout, 1), dtype=jnp.float32)
        return w, b

    keys = jax.random.split(key, 7)
    w1, b1 = dense(keys[0], C1, IN_FEATURES)
    w2, b2 = dense(keys[1], C2, C1)
    w3, b3 = dense(keys[2], C3, C2)
    w4, b4 = dense(keys[3], C4, C3)
    wd, bd = dense(keys[4], DOWNSCALE_CHANNELS, PVCNN_OUT_CHANNELS)
    wo, bo = dense(keys[5], OUT_CONV_CHANNELS, DOWNSCALE_CHANNELS)
    # nn.Linear(n_points -> out_features): W (OUT_FEATURES, N), b (1, OUT_FEATURES)
    kw, kb = jax.random.split(keys[6])
    wl = 0.05 * jax.random.normal(kw, (OUT_FEATURES, N_POINTS), dtype=jnp.float32)
    bl = 0.05 * jax.random.normal(kb, (1, OUT_FEATURES), dtype=jnp.float32)
    return (w1, b1, w2, b2, w3, b3, w4, b4, wd, bd, wo, bo, wl, bl)


# ---------------------------------------------------------------------------
# Pure-JAX reference (un-folded path, mirrors PVCNNEncoder.forward semantics)
# ---------------------------------------------------------------------------
def reference_forward(points, params):
    (w1, b1, w2, b2, w3, b3, w4, b4, wd, bd, wo, bo, wl, bl) = params
    x = jnp.transpose(points, (0, 2, 1))                       # [B, C, N]

    def c1(w, b, h, relu):
        y = jnp.einsum('oc,bcn->bon', w, h) + b[None]
        return jnp.maximum(y, 0.0) if relu else y

    h = c1(w1, b1, x, True)
    h = c1(w2, b2, h, True)
    h = c1(w3, b3, h, True)
    h = c1(w4, b4, h, True)
    h = c1(wd, bd, h, False)
    h = c1(wo, bo, h, False)                                   # [B, 1, N]
    y = jnp.einsum('bon,fn->bof', h, wl) + bl[None]            # [B, 1, F]
    return y[:, 0, :]


if __name__ == "__main__":
    key = jax.random.PRNGKey(0)
    kp, kx = jax.random.split(key)
    params = init_params(kp)

    B = 16
    points = jax.random.normal(kx, (B, N_POINTS, IN_FEATURES), dtype=jnp.float32)

    # block_batch=8 -> grid=(2,) so the "parallel" axis feeds both v7x cores
    out = pvcnn_encoder_forward(points, params, block_batch=8)
    out = jax.block_until_ready(out)

    ref = reference_forward(points, params)
    assert out.shape == (B, OUT_FEATURES), out.shape
    assert jnp.allclose(out, ref, atol=1e-4, rtol=1e-4), \
        float(jnp.max(jnp.abs(out - ref)))

    print("KERNEL_OK")
</pallas_src>

<mosaic_0001>
module attributes {stable_mosaic.version = 11 : i64} {
  func.func @kernel(%arg0: i32, %arg1: memref<3x1024xf32, #tpu.memory_space<vmem>>, %arg2: memref<16x3xf32, #tpu.memory_space<vmem>>, %arg3: memref<16x1xf32, #tpu.memory_space<vmem>>, %arg4: memref<32x16xf32, #tpu.memory_space<vmem>>, %arg5: memref<32x1xf32, #tpu.memory_space<vmem>>, %arg6: memref<64x32xf32, #tpu.memory_space<vmem>>, %arg7: memref<64x1xf32, #tpu.memory_space<vmem>>, %arg8: memref<128x64xf32, #tpu.memory_space<vmem>>, %arg9: memref<128x1xf32, #tpu.memory_space<vmem>>, %arg10: memref<128x1xf32, #tpu.memory_space<vmem>>, %arg11: memref<128x32xf32, #tpu.memory_space<vmem>>, %arg12: memref<1x32xf32, #tpu.memory_space<vmem>>, %arg13: memref<8x32xf32, #tpu.memory_space<vmem>>, %arg14: memref<8x128xf32, #tpu.memory_space<vmem>>) attributes {dimension_semantics = [#tpu.dimension_semantics<parallel>], iteration_bounds = array<i64: 2>, scalar_prefetch = 0 : i64, scratch_operands = 1 : i64, tpu.core_type = #tpu.core_type<tc>, window_params = [{transform_indices = @transform_0, window_bounds = array<i64: 3, 1024>}, {pipeline_mode = #tpu.pipeline_mode<synchronous>, transform_indices = @transform_1, window_bounds = array<i64: 16, 3>}, {pipeline_mode = #tpu.pipeline_mode<synchronous>, transform_indices = @transform_2, window_bounds = array<i64: 16, 1>}, {pipeline_mode = #tpu.pipeline_mode<synchronous>, transform_indices = @transform_3, window_bounds = array<i64: 32, 16>}, {pipeline_mode = #tpu.pipeline_mode<synchronous>, transform_indices = @transform_4, window_bounds = array<i64: 32, 1>}, {pipeline_mode = #tpu.pipeline_mode<synchronous>, transform_indices = @transform_5, window_bounds = array<i64: 64, 32>}, {pipeline_mode = #tpu.pipeline_mode<synchronous>, transform_indices = @transform_6, window_bounds = array<i64: 64, 1>}, {pipeline_mode = #tpu.pipeline_mode<synchronous>, transform_indices = @transform_7, window_bounds = array<i64: 128, 64>}, {pipeline_mode = #tpu.pipeline_mode<synchronous>, transform_indices = @transform_8, window_bounds = array<i64: 128, 1>}, {pipeline_mode = #tpu.pipeline_mode<synchronous>, transform_indices = @transform_9, window_bounds = array<i64: 128, 1>}, {pipeline_mode = #tpu.pipeline_mode<synchronous>, transform_indices = @transform_10, window_bounds = array<i64: 128, 32>}, {pipeline_mode = #tpu.pipeline_mode<synchronous>, transform_indices = @transform_11, window_bounds = array<i64: 1, 32>}, {transform_indices = @transform_12, window_bounds = array<i64: 8, 32>}]} {
    %c0 = arith.constant 0 : index
    %c0_0 = arith.constant 0 : index
    %0 = vector.load %arg1[%c0, %c0_0] : memref<3x1024xf32, #tpu.memory_space<vmem>>, vector<3x1024xf32>
    %c0_1 = arith.constant 0 : index
    %c0_2 = arith.constant 0 : index
    %1 = vector.load %arg2[%c0_1, %c0_2] : memref<16x3xf32, #tpu.memory_space<vmem>>, vector<16x3xf32>
    %cst = arith.constant dense<0.000000e+00> : vector<16x1024xf32>
    %2 = tpu.matmul %1, %0, %cst {dimension_numbers = #tpu.dot_dimension_numbers<[1], [0], [0], [1], [0, 0, 1, 1], [], []>} : vector<16x3xf32>, vector<3x1024xf32>, vector<16x1024xf32> -> vector<16x1024xf32>
    %c0_3 = arith.constant 0 : index
    %c0_4 = arith.constant 0 : index
    %3 = vector.load %arg3[%c0_3, %c0_4] : memref<16x1xf32, #tpu.memory_space<vmem>>, vector<16x1xf32>
    %4 = vector.broadcast %3 : vector<16x1xf32> to vector<16x1024xf32>
    %5 = arith.addf %2, %4 : vector<16x1024xf32>
    %cst_5 = arith.constant 0.000000e+00 : f32
    %6 = vector.broadcast %cst_5 : f32 to vector<16x1024xf32>
    %7 = arith.maximumf %5, %6 : vector<16x1024xf32>
    %c0_6 = arith.constant 0 : index
    %c0_7 = arith.constant 0 : index
    %8 = vector.load %arg4[%c0_6, %c0_7] : memref<32x16xf32, #tpu.memory_space<vmem>>, vector<32x16xf32>
    %cst_8 = arith.constant dense<0.000000e+00> : vector<32x1024xf32>
    %9 = tpu.matmul %8, %7, %cst_8 {dimension_numbers = #tpu.dot_dimension_numbers<[1], [0], [0], [1], [0, 0, 1, 1], [], []>} : vector<32x16xf32>, vector<16x1024xf32>, vector<32x1024xf32> -> vector<32x1024xf32>
    %c0_9 = arith.constant 0 : index
    %c0_10 = arith.constant 0 : index
    %10 = vector.load %arg5[%c0_9, %c0_10] : memref<32x1xf32, #tpu.memory_space<vmem>>, vector<32x1xf32>
    %11 = vector.broadcast %10 : vector<32x1xf32> to vector<32x1024xf32>
    %12 = arith.addf %9, %11 : vector<32x1024xf32>
    %cst_11 = arith.constant 0.000000e+00 : f32
    %13 = vector.broadcast %cst_11 : f32 to vector<32x1024xf32>
    %14 = arith.maximumf %12, %13 : vector<32x1024xf32>
    %c0_12 = arith.constant 0 : index
    %c0_13 = arith.constant 0 : index
    %15 = vector.load %arg6[%c0_12, %c0_13] : memref<64x32xf32, #tpu.memory_space<vmem>>, vector<64x32xf32>
    %cst_14 = arith.constant dense<0.000000e+00> : vector<64x1024xf32>
    %16 = tpu.matmul %15, %14, %cst_14 {dimension_numbers = #tpu.dot_dimension_numbers<[1], [0], [0], [1], [0, 0, 1, 1], [], []>} : vector<64x32xf32>, vector<32x1024xf32>, vector<64x1024xf32> -> vector<64x1024xf32>
    %c0_15 = arith.constant 0 : index
    %c0_16 = arith.constant 0 : index
    %17 = vector.load %arg7[%c0_15, %c0_16] : memref<64x1xf32, #tpu.memory_space<vmem>>, vector<64x1xf32>
    %18 = vector.broadcast %17 : vector<64x1xf32> to vector<64x1024xf32>
    %19 = arith.addf %16, %18 : vector<64x1024xf32>
    %cst_17 = arith.constant 0.000000e+00 : f32
    %20 = vector.broadcast %cst_17 : f32 to vector<64x1024xf32>
    %21 = arith.maximumf %19, %20 : vector<64x1024xf32>
    %c0_18 = arith.constant 0 : index
    %c0_19 = arith.constant 0 : index
    %22 = vector.load %arg8[%c0_18, %c0_19] : memref<128x64xf32, #tpu.memory_space<vmem>>, vector<128x64xf32>
    %cst_20 = arith.constant dense<0.000000e+00> : vector<128x1024xf32>
    %23 = tpu.matmul %22, %21, %cst_20 {dimension_numbers = #tpu.dot_dimension_numbers<[1], [0], [0], [1], [0, 0, 1, 1], [], []>} : vector<128x64xf32>, vector<64x1024xf32>, vector<128x1024xf32> -> vector<128x1024xf32>
    %c0_21 = arith.constant 0 : index
    %c0_22 = arith.constant 0 : index
    %24 = vector.load %arg9[%c0_21, %c0_22] : memref<128x1xf32, #tpu.memory_space<vmem>>, vector<128x1xf32>
    %25 = vector.broadcast %24 : vector<128x1xf32> to vector<128x1024xf32>
    %26 = arith.addf %23, %25 : vector<128x1024xf32>
    %cst_23 = arith.constant 0.000000e+00 : f32
    %27 = vector.broadcast %cst_23 : f32 to vector<128x1024xf32>
    %28 = arith.maximumf %26, %27 : vector<128x1024xf32>
    %c0_24 = arith.constant 0 : index
    %c0_25 = arith.constant 0 : index
    %29 = vector.load %arg10[%c0_24, %c0_25] : memref<128x1xf32, #tpu.memory_space<vmem>>, vector<128x1xf32>
    %30 = vector.broadcast %29 : vector<128x1xf32> to vector<128x1024xf32>
    %31 = arith.mulf %28, %30 : vector<128x1024xf32>
    %cst_26 = arith.constant dense<0.000000e+00> : vector<1024xf32>
    %32 = vector.multi_reduction <add>, %31, %cst_26 [0] : vector<128x1024xf32> to vector<1024xf32>
    %33 = vector.shape_cast %32 : vector<1024xf32> to vector<1x1024xf32>
    %34 = vector.extract_strided_slice %33 {offsets = [0, 0], sizes = [1, 128], strides = [1, 1]} : vector<1x1024xf32> to vector<1x128xf32>
    %c0_27 = arith.constant 0 : index
    %c0_28 = arith.constant 0 : index
    %35 = vector.load %arg14[%c0_27, %c0_28] : memref<8x128xf32, #tpu.memory_space<vmem>>, vector<1x128xf32>
    tpu.vector_store %arg14[%c0_27, %c0_28], %34 {strides = array<i32>} : memref<8x128xf32, #tpu.memory_space<vmem>>, vector<1x128xf32>,
    %36 = vector.extract_strided_slice %33 {offsets = [0, 128], sizes = [1, 128], strides = [1, 1]} : vector<1x1024xf32> to vector<1x128xf32>
    %c1 = arith.constant 1 : index
    %c0_29 = arith.constant 0 : index
    %37 = vector.load %arg14[%c1, %c0_29] : memref<8x128xf32, #tpu.memory_space<vmem>>, vector<1x128xf32>
    tpu.vector_store %arg14[%c1, %c0_29], %36 {strides = array<i32>} : memref<8x128xf32, #tpu.memory_space<vmem>>, vector<1x128xf32>,
    %38 = vector.extract_strided_slice %33 {offsets = [0, 256], sizes = [1, 128], strides = [1, 1]} : vector<1x1024xf32> to vector<1x128xf32>
    %c2 = arith.constant 2 : index
    %c0_30 = arith.constant 0 : index
    %39 = vector.load %arg14[%c2, %c0_30] : memref<8x128xf32, #tpu.memory_space<vmem>>, vector<1x128xf32>
    tpu.vector_store %arg14[%c2, %c0_30], %38 {strides = array<i32>} : memref<8x128xf32, #tpu.memory_space<vmem>>, vector<1x128xf32>,
    %40 = vector.extract_strided_slice %33 {offsets = [0, 384], sizes = [1, 128], strides = [1, 1]} : vector<1x1024xf32> to vector<1x128xf32>
    %c3 = arith.constant 3 : index
    %c0_31 = arith.constant 0 : index
    %41 = vector.load %arg14[%c3, %c0_31] : memref<8x128xf32, #tpu.memory_space<vmem>>, vector<1x128xf32>
    tpu.vector_store %arg14[%c3, %c0_31], %40 {strides = array<i32>} : memref<8x128xf32, #tpu.memory_space<vmem>>, vector<1x128xf32>,
    %42 = vector.extract_strided_slice %33 {offsets = [0, 512], sizes = [1, 128], strides = [1, 1]} : vector<1x1024xf32> to vector<1x128xf32>
    %c4 = arith.constant 4 : index
    %c0_32 = arith.constant 0 : index
    %43 = vector.load %arg14[%c4, %c0_32] : memref<8x128xf32, #tpu.memory_space<vmem>>, vector<1x128xf32>
    tpu.vector_store %arg14[%c4, %c0_32], %42 {strides = array<i32>} : memref<8x128xf32, #tpu.memory_space<vmem>>, vector<1x128xf32>,
    %44 = vector.extract_strided_slice %33 {offsets = [0, 640], sizes = [1, 128], strides = [1, 1]} : vector<1x1024xf32> to vector<1x128xf32>
    %c5 = arith.constant 5 : index
    %c0_33 = arith.constant 0 : index
    %45 = vector.load %arg14[%c5, %c0_33] : memref<8x128xf32, #tpu.memory_space<vmem>>, vector<1x128xf32>
    tpu.vector_store %arg14[%c5, %c0_33], %44 {strides = array<i32>} : memref<8x128xf32, #tpu.memory_space<vmem>>, vector<1x128xf32>,
    %46 = vector.extract_strided_slice %33 {offsets = [0, 768], sizes = [1, 128], strides = [1, 1]} : vector<1x1024xf32> to vector<1x128xf32>
    %c6 = arith.constant 6 : index
    %c0_34 = arith.constant 0 : index
    %47 = vector.load %arg14[%c6, %c0_34] : memref<8x128xf32, #tpu.memory_space<vmem>>, vector<1x128xf32>
    tpu.vector_store %arg14[%c6, %c0_34], %46 {strides = array<i32>} : memref<8x128xf32, #tpu.memory_space<vmem>>, vector<1x128xf32>,
    %48 = vector.extract_strided_slice %33 {offsets = [0, 896], sizes = [1, 128], strides = [1, 1]} : vector<1x1024xf32> to vector<1x128xf32>
    %c7 = arith.constant 7 : index
    %c0_35 = arith.constant 0 : index
    %49 = vector.load %arg14[%c7, %c0_35] : memref<8x128xf32, #tpu.memory_space<vmem>>, vector<1x128xf32>
    tpu.vector_store %arg14[%c7, %c0_35], %48 {strides = array<i32>} : memref<8x128xf32, #tpu.memory_space<vmem>>, vector<1x128xf32>,
    %c0_36 = arith.constant 0 : index
    %c0_37 = arith.constant 0 : index
    %50 = vector.load %arg14[%c0_36, %c0_37] : memref<8x128xf32, #tpu.memory_space<vmem>>, vector<8x128xf32>
    %c0_38 = arith.constant 0 : index
    %c0_39 = arith.constant 0 : index
    %51 = vector.load %arg11[%c0_38, %c0_39] : memref<128x32xf32, #tpu.memory_space<vmem>>, vector<128x32xf32>
    %cst_40 = arith.constant dense<0.000000e+00> : vector<8x32xf32>
    %52 = tpu.matmul %50, %51, %cst_40 {dimension_numbers = #tpu.dot_dimension_numbers<[1], [0], [0], [1], [0, 0, 1, 1], [], []>} : vector<8x128xf32>, vector<128x32xf32>, vector<8x32xf32> -> vector<8x32xf32>
    %c0_41 = arith.constant 0 : index
    %c0_42 = arith.constant 0 : index
    %53 = vector.load %arg12[%c0_41, %c0_42] : memref<1x32xf32, #tpu.memory_space<vmem>>, vector<1x32xf32>
    %54 = vector.broadcast %53 : vector<1x32xf32> to vector<8x32xf32>
    %55 = arith.addf %52, %54 : vector<8x32xf32>
    %c0_43 = arith.constant 0 : index
    %c0_44 = arith.constant 0 : index
    %56 = vector.load %arg13[%c0_43, %c0_44] : memref<8x32xf32, #tpu.memory_space<vmem>>, vector<8x32xf32>
    tpu.vector_store %arg13[%c0_43, %c0_44], %55 {strides = array<i32>} : memref<8x32xf32, #tpu.memory_space<vmem>>, vector<8x32xf32>,
    return
  }
  func.func @transform_0(%arg0: i32) -> (i32, i32) {
    %c0_i32 = arith.constant 0 : i32
    %c0_i32_0 = arith.constant 0 : i32
    return %c0_i32, %arg0 : i32, i32
  }
  func.func @transform_1(%arg0: i32) -> (i32, i32) {
    %c0_i32 = arith.constant 0 : i32
    %c0_i32_0 = arith.constant 0 : i32
    %c0_i32_1 = arith.constant 0 : i32
    return %c0_i32, %c0_i32_0 : i32, i32
  }
  func.func @transform_2(%arg0: i32) -> (i32, i32) {
    %c0_i32 = arith.constant 0 : i32
    %c0_i32_0 = arith.constant 0 : i32
    %c0_i32_1 = arith.constant 0 : i32
    return %c0_i32, %c0_i32_0 : i32, i32
  }
  func.func @transform_3(%arg0: i32) -> (i32, i32) {
    %c0_i32 = arith.constant 0 : i32
    %c0_i32_0 = arith.constant 0 : i32
    %c0_i32_1 = arith.constant 0 : i32
    return %c0_i32, %c0_i32_0 : i32, i32
  }
  func.func @transform_4(%arg0: i32) -> (i32, i32) {
    %c0_i32 = arith.constant 0 : i32
    %c0_i32_0 = arith.constant 0 : i32
    %c0_i32_1 = arith.constant 0 : i32
    return %c0_i32, %c0_i32_0 : i32, i32
  }
  func.func @transform_5(%arg0: i32) -> (i32, i32) {
    %c0_i32 = arith.constant 0 : i32
    %c0_i32_0 = arith.constant 0 : i32
    %c0_i32_1 = arith.constant 0 : i32
    return %c0_i32, %c0_i32_0 : i32, i32
  }
  func.func @transform_6(%arg0: i32) -> (i32, i32) {
    %c0_i32 = arith.constant 0 : i32
    %c0_i32_0 = arith.constant 0 : i32
    %c0_i32_1 = arith.constant 0 : i32
    return %c0_i32, %c0_i32_0 : i32, i32
  }
  func.func @transform_7(%arg0: i32) -> (i32, i32) {
    %c0_i32 = arith.constant 0 : i32
    %c0_i32_0 = arith.constant 0 : i32
    %c0_i32_1 = arith.constant 0 : i32
    return %c0_i32, %c0_i32_0 : i32, i32
  }
  func.func @transform_8(%arg0: i32) -> (i32, i32) {
    %c0_i32 = arith.constant 0 : i32
    %c0_i32_0 = arith.constant 0 : i32
    %c0_i32_1 = arith.constant 0 : i32
    return %c0_i32, %c0_i32_0 : i32, i32
  }
  func.func @transform_9(%arg0: i32) -> (i32, i32) {
    %c0_i32 = arith.constant 0 : i32
    %c0_i32_0 = arith.constant 0 : i32
    %c0_i32_1 = arith.constant 0 : i32
    return %c0_i32, %c0_i32_0 : i32, i32
  }
  func.func @transform_10(%arg0: i32) -> (i32, i32) {
    %c0_i32 = arith.constant 0 : i32
    %c0_i32_0 = arith.constant 0 : i32
    %c0_i32_1 = arith.constant 0 : i32
    return %c0_i32, %c0_i32_0 : i32, i32
  }
  func.func @transform_11(%arg0: i32) -> (i32, i32) {
    %c0_i32 = arith.constant 0 : i32
    %c0_i32_0 = arith.constant 0 : i32
    %c0_i32_1 = arith.constant 0 : i32
    return %c0_i32, %c0_i32_0 : i32, i32
  }
  func.func @transform_12(%arg0: i32) -> (i32, i32) {
    %c0_i32 = arith.constant 0 : i32
    %c0_i32_0 = arith.constant 0 : i32
    return %arg0, %c0_i32 : i32, i32
  }
}

</mosaic_0001>

<bundles_post_ra>
// kernel: pvcnn_encoder_forward.1
= control target key start
LH: loop header
LB: loop body
LE: loop exit
PB: predicated region body
PF: predicated region fallthrough
CT: control target
= control target key end

     0   :  { %s5010_s0 = inlined_call_operand.vmem [shape: f32[3,2048], index: 0, kind: input, shape index: {}]   ;;  %s5011_s1 = inlined_call_operand.vmem [shape: f32[16,3], index: 1, kind: input, shape index: {}]   ;;  %s5012_s2 = inlined_call_operand.vmem [shape: f32[16,1], index: 2, kind: input, shape index: {}]   ;;  %s5013_s3 = inlined_call_operand.vmem [shape: f32[32,16], index: 3, kind: input, shape index: {}]   ;;  %s5014_s4 = inlined_call_operand.vmem [shape: f32[32,1], index: 4, kind: input, shape index: {}]   ;;  %s5015_s5 = inlined_call_operand.vmem [shape: f32[64,32], index: 5, kind: input, shape index: {}]   ;;  %s5016_s6 = inlined_call_operand.vmem [shape: f32[64,1], index: 6, kind: input, shape index: {}]   ;;  %s5017_s7 = inlined_call_operand.vmem [shape: f32[128,64], index: 7, kind: input, shape index: {}]   ;;  %s5018_s8 = inlined_call_operand.vmem [shape: f32[128,1], index: 8, kind: input, shape index: {}]   ;;  %s5019_s9 = inlined_call_operand.vmem [shape: f32[128,1], index: 9, kind: input, shape index: {}]   ;;  %s5020_s10 = inlined_call_operand.vmem [shape: f32[128,32], index: 10, kind: input, shape index: {}]   ;;  %s5021_s11 = inlined_call_operand.vmem [shape: f32[1,32], index: 11, kind: input, shape index: {}]   ;;  %s5022_s12 = inlined_call_operand.hbm [shape: f32[16,32], index: 12, kind: output, shape index: {}]  }
   0x1   :  { %5028 = sst [smem:[#allocation7_spill]] %s5010_s0 }
   0x2   :  { %5029 = sst [smem:[#allocation8_spill]] %s5011_s1 }
   0x3   :  { %17 = vsyncpa [#allocation4], 0 }
   0x4   :  { %19 = vsyncpa [#allocation4 + $0x1], 0  ;;  %s3826_s21 = smov 0   ;;  %s3828_s22 = smov 0  }
   0x5   :  { %s3830_s23 = smov 0   ;;  %s3832_s24 = smov 0  }
   0x6 LB: > { %s3847_s25 = sadd.s32 4294967295, %s3754_s24   ;;  %s3315_s26 = sadd.s32 4294967294, %s3754_s24   ;;  %s3754_s24 = sphi %s3832_s24, %s5041_s24   ;;  %s3750_s23 = sphi %s3830_s23, %s5040_s23   ;;  %s3746_s22 = sphi %s3828_s22, %s5039_s22   ;;  %s3742_s21 = sphi %s3826_s21, %s5038_s21  }
   0x7   : > { %s3851_s27 = sadd.s32 1, %s3754_s24   ;;  %s289_s28 = sadd.s32 1, %s3750_s23 }
   0x8   : > { %s286_s29 = ssub.s32 %s3754_s24, %s3851_s27  ;;  %p299_p0 = scmp.ne.s32.totalorder %s3750_s23, %s3746_s22 }
   0x9   : > { %p287_p1 = scmp.eq.s32.totalorder %s286_s29, 0  ;;  %p300_p2 = scmp.eq.s32.totalorder %s3847_s25, 1 }
   0xa   : > { %p305_p3 = scmp.ne.s32.totalorder %s3746_s22, %s3742_s21  ;;  %p306_p4 = scmp.eq.s32.totalorder %s3315_s26, 1 }
   0xb   : > { %s3862_s30 = scalar_select %p287_p1, %s3750_s23, %s289_s28  }
   0xc   : > { %p3864_p5 = por %p300_p2, %p299_p0  ;;  %p3868_p6 = por %p306_p4, %p305_p3 }
   0xd   : > { %p3318_p7 = scmp.ge.s32.totalorder %s3754_s24, 1  ;;  %p366_p8 = scmp.lt.s32.totalorder %s3754_s24, 3 }
   0xf   : > { %p367_p9 = pnand %p3318_p7, %p366_p8 }
  0x11   : > { %370 = sbr.rel (%p367_p9) target bundleno = 1347 (0x543), region = 68 }
  0x18   : > { %v420_v0 = vld [vmem:[%s5012_s2] sm:$0xff]  ;;  %s3320_s17 = sshll.u32 %s3847_s25, 3  ;;  %v3756_v1 = vmov 0   ;;  %v5023_v2 = vmov 0.0   ;;  %v421_v3 = vld [vmem:[%s5012_s2 + $0x8] sm:$0xff]  ;;  %s5032_s0 = sld [smem:[#allocation7_spill]] }
  0x19   : > { %3686 = vset.pattern.permute.xlu0 %v3756_v1  ;;  %p409_p10 = scmp.lt.s32.totalorder %s3320_s17, 15  ;;  %528 = vmatprep.mubr.f32.mxu0 %v5023_v2  ;;  %vm447_vm0 = vcmask 1042432   ;;  %s5033_s1 = sld [smem:[#allocation8_spill]]  ;;  %vm440_vm1 = vcmask 23552   ;;  %v794_v12 = vld [vmem:[%s5014_s4 + $0x10] sm:$0xff]  ;;  %v1225_v15 = vld [vmem:[%s5016_s6] sm:$0xff] }
  0x1a   : > { %424 = vperm.xlu0 %3686, %v420_v0   ;;  %605 = vmatprep.mubr.f32.mxu1 %v5023_v2  ;;  %v1227_v16 = vld [vmem:[%s5016_s6 + $0x10] sm:$0xff]  ;;  %v1229_v17 = vld [vmem:[%s5016_s6 + $0x20] sm:$0xff]  ;;  %v1835_v23 = vld [vmem:[%s5018_s8 + $0x28] sm:$0xff]  ;;  %vm816_vm2 = vcmask 130048   ;;  %vm1273_vm3 = vcmask 261120   ;;  %vm1926_vm4 = vcmask 523264  }
  0x1b   : > { %s5043_s17 = smov (!%p409_p10, %s3320_s17), 15  ;;  %3687 = vset.pattern.permute.xlu1 %v3756_v1  ;;  %v1231_v18 = vld [vmem:[%s5016_s6 + $0x30] sm:$0xff]  ;;  %v1830_v19 = vld [vmem:[%s5018_s8] sm:$0xff]  ;;  %v1837_v25 = vld [vmem:[%s5018_s8 + $0x38] sm:$0xff]  ;;  %vm3759_vm5 = vmmov 0  }
  0x1c   : > { %s3321_s20 = sshll.u32 %s5043_s17, 2  ;;  %v1832_v20 = vld [vmem:[%s5018_s8 + $0x10] sm:$0xff]  ;;  %v2747_v21 = vld [vmem:[%s5019_s9] sm:$0xff]  ;;  %v1839_v27 = vld [vmem:[%s5018_s8 + $0x48] sm:$0xff] }
  0x1d   : > { %v1834_v22 = vld [vmem:[%s5018_s8 + $0x20] sm:$0xff]  ;;  %v1836_v24 = vld [vmem:[%s5018_s8 + $0x30] sm:$0xff]  ;;  %v1841_v29 = vld [vmem:[%s5018_s8 + $0x58] sm:$0xff] }
  0x1e   : > { %s412_s29 = scalar_lea.vmem %s5032_s0, %s3321_s20  ;;  %429 = vperm.xlu0 %3686, %v421_v3   ;;  %v1838_v26 = vld [vmem:[%s5018_s8 + $0x40] sm:$0xff]  ;;  %v1840_v28 = vld [vmem:[%s5018_s8 + $0x50] sm:$0xff]  ;;  %v1843_v31 = vld [vmem:[%s5018_s8 + $0x68] sm:$0xff]  ;;  %s405_s0 = sand.u32 1, %s3746_s22  }
  0x1f   : > { %v414_v4 = vld [vmem:[%s412_s29] sm:$0x77]  ;;  %v415_v5 = vld [vmem:[%s412_s29 + $0x8] sm:$0x77]  ;;  %v416_v6 = vld [vmem:[%s412_s29 + $0x10] sm:$0x77] }
  0x20   : > { %v436_v7 = vcombine.high %v414_v4, %v414_v4  ;;  %v437_v8 = vcombine.high %v415_v5, %v415_v5  ;;  %v417_v9 = vld [vmem:[%s412_s29 + $0x18] sm:$0x77]  ;;  %v418_v10 = vld [vmem:[%s5033_s1] sm:$0xff]  ;;  %v438_v11 = vcombine.high %v416_v6, %v416_v6  ;;  %v419_v14 = vld [vmem:[%s5033_s1 + $0x8] sm:$0xff]  ;;  %s3319_s17 = sshll.u32 %s405_s0, 3  ;;  %s3452_s20 = sshll.u32 %s3847_s25, 7 }
  0x21   : > { %v439_v13 = vcombine.high %v417_v9, %v417_v9  ;;  %v1842_v30 = vld [vmem:[%s5018_s8 + $0x60] sm:$0xff]  ;;  %v1844_v32 = vld [vmem:[%s5018_s8 + $0x70] sm:$0xff]  ;;  %v1845_v33 = vld [vmem:[%s5018_s8 + $0x78] sm:$0xff]  ;;  %s407_s26 = scalar_lea.vmem [#allocation3], %s3319_s17  ;;  %s4967_s16 = scalar_lea.hbm %s5022_s12, %s3452_s20 }
  0x22   : > { %3322 = vmatprep.subr.msk.mxu0 %vm447_vm0, %v436_v7  ;;  %3326 = vmatprep.subr.msk.mxu1 %vm447_vm0, %v437_v8  ;;  %v2761_v34 = vld [vmem:[%s5019_s9 + $0x70] sm:$0xff]  ;;  %v792_v35 = vld [vmem:[%s5014_s4] sm:$0xff]  ;;  %v793_v36 = vld [vmem:[%s5014_s4 + $0x8] sm:$0xff]  ;;  %s3256_s28 = sshll.u32 %s407_s26, 4  ;;  %s3243_s18 = scalar_lea.sflag [#allocation4], %s405_s0  ;;  %s4969_s28 = int_to_ptr.vmem [resolvable:$true] %s3256_s28 }
  0x23   : > { %3323 = vmatpush1.msk.msra.mxu0 %vm447_vm0, %v414_v4  ;;  %3327 = vmatpush1.msk.msra.mxu1 %vm447_vm0, %v415_v5  ;;  %v795_v37 = vld [vmem:[%s5014_s4 + $0x18] sm:$0xff]  ;;  %v1226_v38 = vld [vmem:[%s5016_s6 + $0x8] sm:$0xff]  ;;  %v2749_v45 = vld [vmem:[%s5019_s9 + $0x10] sm:$0xff]  ;;  %s3692_s19 = scalar_lea.vmem %s4969_s28, 128  ;;  %s3760_s25 = smov [#allocation3]  }
  0x24   : > { %3324 = vmatmul.mubr.msk.f32.vlgmr.msra.gmra.mrb[0].mxu0 %vm440_vm1, %v418_v10  ;;  %3328 = vmatmul.mubr.msk.f32.vlgmr.msra.gmra.mrb[0].mxu1 %vm440_vm1, %v418_v10  ;;  %v1228_v39 = vld [vmem:[%s5016_s6 + $0x18] sm:$0xff]  ;;  %v1230_v40 = vld [vmem:[%s5016_s6 + $0x28] sm:$0xff]  ;;  %v2751_v47 = vld [vmem:[%s5019_s9 + $0x20] sm:$0xff]  ;;  %p3693_p11 = scmp.ne.s32.totalorder %s4969_s28, %s3692_s19  ;;  %s3696_s17 = sshll.u32 %s3760_s25, 4  ;;  %s3697_s17 = int_to_ptr.vmem [resolvable:$false] %s3696_s17 }
  0x25   : > { %534 = vmatprep.mubr.f32.mxu0 %v5023_v2  ;;  %611 = vmatprep.mubr.f32.mxu1 %v5023_v2  ;;  %v1232_v41 = vld [vmem:[%s5016_s6 + $0x38] sm:$0xff]  ;;  %v1831_v42 = vld [vmem:[%s5018_s8 + $0x8] sm:$0xff]  ;;  %v2753_v49 = vld [vmem:[%s5019_s9 + $0x30] sm:$0xff]  ;;  %s3698_s1 = scalar_lea.vmem %s3697_s17, 256  ;;  %p3699_p0 = scmp.lt.s32.totalorder %s4969_s28, %s3697_s17 }
  0x26   : > { %808 = vperm.xlu0 %3686, %v794_v12   ;;  %3330 = vmatprep.subr.msk.mxu0 %vm447_vm0, %v438_v11  ;;  %v1833_v43 = vld [vmem:[%s5018_s8 + $0x18] sm:$0xff]  ;;  %v2748_v44 = vld [vmem:[%s5019_s9 + $0x8] sm:$0xff]  ;;  %v2755_v51 = vld [vmem:[%s5019_s9 + $0x40] sm:$0xff]  ;;  %p3694_p12 = pnand %p3693_p11, %p3864_p5  ;;  %p3700_p1 = scmp.lt.s32.totalorder %s3698_s1, %s3692_s19 }
  0x27   : > { %3334 = vmatprep.subr.msk.mxu1 %vm447_vm0, %v439_v13  ;;  %3331 = vmatpush1.msk.msra.mxu0 %vm447_vm0, %v416_v6  ;;  %v2750_v46 = vld [vmem:[%s5019_s9 + $0x18] sm:$0xff]  ;;  %v2752_v48 = vld [vmem:[%s5019_s9 + $0x28] sm:$0xff]  ;;  %v2757_v53 = vld [vmem:[%s5019_s9 + $0x50] sm:$0xff] }
  0x28   : > { %3325 = vmatmul.mubr.msk.f32.gmra.mrb[2].mxu0 %vm440_vm1, %v419_v14  ;;  %3329 = vmatmul.mubr.msk.f32.gmra.mrb[2].mxu1 %vm440_vm1, %v419_v14  ;;  %v2754_v50 = vld [vmem:[%s5019_s9 + $0x38] sm:$0xff]  ;;  %v2756_v52 = vld [vmem:[%s5019_s9 + $0x48] sm:$0xff]  ;;  %v2759_v55 = vld [vmem:[%s5019_s9 + $0x60] sm:$0xff]  ;;  %p3695_p13 = pneg %p3694_p12  ;;  %p3701_p2 = por %p3700_p1, %p3699_p0 }
  0x29   : > { %682 = vmatprep.mubr.f32.mxu0 %v5023_v2  ;;  %3335 = vmatpush1.msk.msra.mxu1 %vm447_vm0, %v417_v9  ;;  %v2758_v54 = vld [vmem:[%s5019_s9 + $0x58] sm:$0xff]  ;;  %v2760_v56 = vld [vmem:[%s5019_s9 + $0x68] sm:$0xff] }
  0x2a   : > { %759 = vmatprep.mubr.f32.mxu1 %v5023_v2  ;;  %1235 = vperm.xlu0 %3686, %v1225_v15   ;;  %v2762_v57 = vld [vmem:[%s5019_s9 + $0x78] sm:$0xff]  ;;  %p3702_p3 = pnand %p3701_p2, %p3695_p13 }
  0x2b   : > { %798 = vperm.xlu1 %3687, %v792_v35  }
  0x2c   : > { %3332 = vmatmul.mubr.msk.f32.vlgmr.msra.gmra.mrb[4].mxu0 %vm440_vm1, %v418_v10  ;;  %3336 = vmatmul.mubr.msk.f32.vlgmr.msra.gmra.mrb[4].mxu1 %vm440_vm1, %v418_v10 }
  0x2d   : > { %688 = vmatprep.mubr.f32.mxu0 %v5023_v2  ;;  %765 = vmatprep.mubr.f32.mxu1 %v5023_v2 }
  0x2e   : > { %1245 = vperm.xlu0 %3686, %v1227_v16  }
  0x2f   : > { %803 = vperm.xlu1 %3687, %v793_v36  }
  0x30   : > { %3333 = vmatmul.mubr.msk.f32.gmra.mrb[6].mxu0 %vm440_vm1, %v419_v14  ;;  %3337 = vmatmul.mubr.msk.f32.gmra.mrb[6].mxu1 %vm440_vm1, %v419_v14 }
  0x31   : > { %893 = vmatprep.mubr.f32.mxu0 %v5023_v2  ;;  %982 = vmatprep.mubr.f32.mxu1 %v5023_v2 }
  0x32   : > { %1255 = vperm.xlu0 %3686, %v1229_v17  }
  0x33   : > { %813 = vperm.xlu1 %3687, %v795_v37  }
  0x36   : > { %1265 = vperm.xlu0 %3686, %v1231_v18  }
  0x37   : > { %1240 = vperm.xlu1 %3687, %v1226_v38  }
  0x3a   : > { %1848 = vperm.xlu0 %3686, %v1830_v19  }
  0x3b   : > { %1250 = vperm.xlu1 %3687, %v1228_v39   ;;  %v788_v39 = vld [vmem:[%s5013_s3] sm:$0xff] }
  0x3e   : > { %1858 = vperm.xlu0 %3686, %v1832_v20  }
  0x3f   : > { %1260 = vperm.xlu1 %3687, %v1230_v40  }
  0x42   : > { %2765 = vperm.xlu0 %3686, %v2747_v21  }
  0x43   : > { %1270 = vperm.xlu1 %3687, %v1232_v41  }
  0x46   : > { %1868 = vperm.xlu0 %3686, %v1834_v22  }
  0x47   : > { %1853 = vperm.xlu1 %3687, %v1831_v42  }
  0x4a   : > { %1873 = vperm.xlu0 %3686, %v1835_v23  }
  0x4b   : > { %1863 = vperm.xlu1 %3687, %v1833_v43  }
  0x4e   : > { %1878 = vperm.xlu0 %3686, %v1836_v24  }
  0x4f   : > { %2770 = vperm.xlu1 %3687, %v2748_v44  }
  0x52   : > { %1883 = vperm.xlu0 %3686, %v1837_v25  }
  0x53   : > { %2775 = vperm.xlu1 %3687, %v2749_v45  }
  0x56   : > { %1888 = vperm.xlu0 %3686, %v1838_v26  }
  0x57   : > { %2780 = vperm.xlu1 %3687, %v2750_v46  }
  0x5a   : > { %1893 = vperm.xlu0 %3686, %v1839_v27  }
  0x5b   : > { %2785 = vperm.xlu1 %3687, %v2751_v47  }
  0x5e   : > { %1898 = vperm.xlu0 %3686, %v1840_v28  }
  0x5f   : > { %2790 = vperm.xlu1 %3687, %v2752_v48  }
  0x62   : > { %1903 = vperm.xlu0 %3686, %v1841_v29  }
  0x63   : > { %2795 = vperm.xlu1 %3687, %v2753_v49  }
  0x66   : > { %1908 = vperm.xlu0 %3686, %v1842_v30  }
  0x67   : > { %2800 = vperm.xlu1 %3687, %v2754_v50  }
  0x6a   : > { %1913 = vperm.xlu0 %3686, %v1843_v31  }
  0x6b   : > { %2805 = vperm.xlu1 %3687, %v2755_v51  }
  0x6e   : > { %1918 = vperm.xlu0 %3686, %v1844_v32  }
  0x6f   : > { %2810 = vperm.xlu1 %3687, %v2756_v52   ;;  %v789_v52 = vld [vmem:[%s5013_s3 + $0x8] sm:$0xff] }
  0x72   : > { %1923 = vperm.xlu0 %3686, %v1845_v33  }
  0x73   : > { %2815 = vperm.xlu1 %3687, %v2757_v53  }
  0x76   : > { %2835 = vperm.xlu0 %3686, %v2761_v34  }
  0x77   : > { %2820 = vperm.xlu1 %3687, %v2758_v54  }
  0x7b   : > { %2825 = vperm.xlu1 %3687, %v2759_v55   ;;  %v790_v55 = vld [vmem:[%s5013_s3 + $0x10] sm:$0xff] }
  0x7f   : > { %2830 = vperm.xlu1 %3687, %v2760_v56   ;;  %v791_v56 = vld [vmem:[%s5013_s3 + $0x18] sm:$0xff] }
  0x83   : > { %2840 = vperm.xlu1 %3687, %v2762_v57  }
  0x99   : > { %v425_v58 = vpop.permute.xlu0 %424 }
  0x9d   : > { %v430_v63 = vpop.permute.xlu0 %429 }
  0xaa   : > { %v4092_v57 = vpop.permute.xlu1 %798 }
  0xf7   : > { %v530_v59 = vpop.f32.mrb[0].mxu0  ;;  %v607_v60 = vpop.f32.mrb[0].mxu1 }
  0xf8   : > { %v532_v61 = vpop.f32.mrb[1].mxu0  ;;  %v609_v62 = vpop.f32.mrb[1].mxu1  ;;  %v531_v0 = vadd.f32 %v530_v59, %v425_v58  ;;  %v608_v1 = vadd.f32 %v607_v60, %v425_v58 }
  0xf9   : > { %v533_v3 = vadd.f32 %v532_v61, %v425_v58  ;;  %v610_v4 = vadd.f32 %v609_v62, %v425_v58  ;;  %v4094_v62 = vpop.permute.xlu1 %803 }
  0xfa   : > { %v772_v13 = vmax.f32 %v531_v0, 0.0  ;;  %v774_v14 = vmax.f32 %v608_v1, 0.0 }
  0xfb   : > { %v536_v5 = vpop.f32.mrb[2].mxu0  ;;  %v613_v6 = vpop.f32.mrb[2].mxu1  ;;  %v773_v17 = vmax.f32 %v533_v3, 0.0  ;;  %v775_v18 = vmax.f32 %v610_v4, 0.0 }
  0xfc   : > { %v537_v7 = vadd.f32 %v536_v5, %v430_v63  ;;  %v614_v8 = vadd.f32 %v613_v6, %v430_v63  ;;  %v538_v9 = vpop.f32.mrb[3].mxu0  ;;  %v615_v10 = vpop.f32.mrb[3].mxu1 }
  0xfd   : > { %v539_v11 = vadd.f32 %v538_v9, %v430_v63  ;;  %v616_v12 = vadd.f32 %v615_v10, %v430_v63 }
  0xfe   : > { %v780_v15 = vmax.f32 %v537_v7, 0.0  ;;  %v782_v16 = vmax.f32 %v614_v8, 0.0 }
  0xff   : > { %v781_v19 = vmax.f32 %v539_v11, 0.0  ;;  %v783_v20 = vmax.f32 %v616_v12, 0.0  ;;  %v684_v21 = vpop.f32.mrb[4].mxu0  ;;  %v761_v22 = vpop.f32.mrb[4].mxu1 }
 0x100   : > { %v3509_v23 = vpack.c.bf16 %v780_v15, %v772_v13  ;;  %v3513_v24 = vpack.c.bf16 %v782_v16, %v774_v14  ;;  %v686_v25 = vpop.f32.mrb[5].mxu0  ;;  %v763_v26 = vpop.f32.mrb[5].mxu1  ;;  %v685_v29 = vadd.f32 %v684_v21, %v425_v58  ;;  %v762_v30 = vadd.f32 %v761_v22, %v425_v58 }
 0x101   : > { %v3507_v27 = vpack.c.bf16 %v781_v19, %v773_v17  ;;  %v3511_v28 = vpack.c.bf16 %v783_v20, %v775_v18  ;;  %v687_v31 = vadd.f32 %v686_v25, %v425_v58  ;;  %v764_v32 = vadd.f32 %v763_v26, %v425_v58  ;;  %v4104_v26 = vpop.permute.xlu0 %808 }
 0x102   : > { %v776_v42 = vmax.f32 %v685_v29, 0.0  ;;  %v778_v43 = vmax.f32 %v762_v30, 0.0  ;;  %v4106_v29 = vpop.permute.xlu1 %813 }
 0x103   : > { %v690_v33 = vpop.f32.mrb[6].mxu0  ;;  %v767_v34 = vpop.f32.mrb[6].mxu1  ;;  %3508 = vmatprep.subr.bf16.mxu0 %v3507_v27  ;;  %3512 = vmatprep.subr.bf16.mxu1 %v3511_v28  ;;  %v777_v46 = vmax.f32 %v687_v31, 0.0  ;;  %v779_v47 = vmax.f32 %v764_v32, 0.0 }
 0x104   : > { %v691_v35 = vadd.f32 %v690_v33, %v430_v63  ;;  %v768_v36 = vadd.f32 %v767_v34, %v430_v63  ;;  %v692_v37 = vpop.f32.mrb[7].mxu0  ;;  %v769_v38 = vpop.f32.mrb[7].mxu1  ;;  %3510 = vmatpush1.bf16.msra.mxu0 %v3509_v23  ;;  %3514 = vmatpush1.bf16.msra.mxu1 %v3513_v24 }
 0x105   : > { %v693_v40 = vadd.f32 %v692_v37, %v430_v63  ;;  %v770_v41 = vadd.f32 %v769_v38, %v430_v63 }
 0x106   : > { %v784_v44 = vmax.f32 %v691_v35, 0.0  ;;  %v786_v45 = vmax.f32 %v768_v36, 0.0 }
 0x107   : > { %v785_v48 = vmax.f32 %v693_v40, 0.0  ;;  %v787_v49 = vmax.f32 %v770_v41, 0.0  ;;  %3338 = vmatmul.mubr.msk.f32.vlgmr.msra.gmra.mrb[8].mxu0 %vm816_vm2, %v788_v39  ;;  %3342 = vmatmul.mubr.msk.f32.vlgmr.msra.gmra.mrb[8].mxu1 %vm816_vm2, %v788_v39 }
 0x108   : > { %v3517_v50 = vpack.c.bf16 %v784_v44, %v776_v42  ;;  %v3521_v51 = vpack.c.bf16 %v786_v45, %v778_v43  ;;  %899 = vmatprep.mubr.f32.mxu0 %v5023_v2  ;;  %988 = vmatprep.mubr.f32.mxu1 %v5023_v2 }
 0x109   : > { %v3515_v53 = vpack.c.bf16 %v785_v48, %v777_v46  ;;  %v3519_v54 = vpack.c.bf16 %v787_v49, %v779_v47 }
 0x10b   : > { %3339 = vmatmul.mubr.msk.f32.gmra.mrb[10].mxu0 %vm816_vm2, %v789_v52  ;;  %3343 = vmatmul.mubr.msk.f32.gmra.mrb[10].mxu1 %vm816_vm2, %v789_v52 }
 0x10c   : > { %3516 = vmatprep.subr.bf16.mxu0 %v3515_v53  ;;  %3520 = vmatprep.subr.bf16.mxu1 %v3519_v54 }
 0x10d   : > { %3518 = vmatpush1.bf16.msra.mxu0 %v3517_v50  ;;  %3522 = vmatpush1.bf16.msra.mxu1 %v3521_v51 }
 0x10e   : > { %905 = vmatprep.mubr.f32.mxu0 %v5023_v2  ;;  %994 = vmatprep.mubr.f32.mxu1 %v5023_v2 }
 0x10f   : > { %3340 = vmatmul.mubr.msk.f32.gmra.mrb[12].mxu0 %vm816_vm2, %v790_v55  ;;  %3344 = vmatmul.mubr.msk.f32.gmra.mrb[12].mxu1 %vm816_vm2, %v790_v55 }
 0x110   : > { %911 = vmatprep.mubr.f32.mxu0 %v5023_v2  ;;  %1000 = vmatprep.mubr.f32.mxu1 %v5023_v2 }
 0x113   : > { %3341 = vmatmul.mubr.msk.f32.gmra.mrb[14].mxu0 %vm816_vm2, %v791_v56  ;;  %3345 = vmatmul.mubr.msk.f32.gmra.mrb[14].mxu1 %vm816_vm2, %v791_v56 }
 0x114   : > { %1071 = vmatprep.mubr.f32.mxu0 %v5023_v2  ;;  %1160 = vmatprep.mubr.f32.mxu1 %v5023_v2 }
 0x117   : > { %3346 = vmatmul.mubr.msk.f32.vlgmr.msra.gmra.mrb[16].mxu0 %vm816_vm2, %v788_v39  ;;  %3350 = vmatmul.mubr.msk.f32.vlgmr.msra.gmra.mrb[16].mxu1 %vm816_vm2, %v788_v39 }
 0x118   : > { %1077 = vmatprep.mubr.f32.mxu0 %v5023_v2  ;;  %1166 = vmatprep.mubr.f32.mxu1 %v5023_v2 }
 0x11b   : > { %3347 = vmatmul.mubr.msk.f32.gmra.mrb[18].mxu0 %vm816_vm2, %v789_v52  ;;  %3351 = vmatmul.mubr.msk.f32.gmra.mrb[18].mxu1 %vm816_vm2, %v789_v52 }
 0x11c   : > { %1083 = vmatprep.mubr.f32.mxu0 %v5023_v2  ;;  %1172 = vmatprep.mubr.f32.mxu1 %v5023_v2 }
 0x11f   : > { %3348 = vmatmul.mubr.msk.f32.gmra.mrb[20].mxu0 %vm816_vm2, %v790_v55  ;;  %3352 = vmatmul.mubr.msk.f32.gmra.mrb[20].mxu1 %vm816_vm2, %v790_v55 }
 0x120   : > { %1089 = vmatprep.mubr.f32.mxu0 %v5023_v2  ;;  %1178 = vmatprep.mubr.f32.mxu1 %v5023_v2 }
 0x123   : > { %3349 = vmatmul.mubr.msk.f32.gmra.mrb[22].mxu0 %vm816_vm2, %v791_v56  ;;  %3353 = vmatmul.mubr.msk.f32.gmra.mrb[22].mxu1 %vm816_vm2, %v791_v56 }
 0x124   : > { %1362 = vmatprep.mubr.f32.mxu0 %v5023_v2  ;;  %1475 = vmatprep.mubr.f32.mxu1 %v5023_v2 }
 0x1da   : > { %v895_v58 = vpop.f32.mrb[8].mxu0  ;;  %v984_v59 = vpop.f32.mrb[8].mxu1 }
 0x1db   : > { %v897_v60 = vpop.f32.mrb[9].mxu0  ;;  %v986_v61 = vpop.f32.mrb[9].mxu1  ;;  %v896_v63 = vadd.f32 %v895_v58, %v4092_v57  ;;  %v985_v0 = vadd.f32 %v984_v59, %v4092_v57 }
 0x1dc   : > { %v898_v1 = vadd.f32 %v897_v60, %v4092_v57  ;;  %v987_v3 = vadd.f32 %v986_v61, %v4092_v57 }
 0x1dd   : > { %v1185_v12 = vmax.f32 %v896_v63, 0.0  ;;  %v1187_v13 = vmax.f32 %v985_v0, 0.0 }
 0x1de   : > { %v901_v4 = vpop.f32.mrb[10].mxu0  ;;  %v990_v5 = vpop.f32.mrb[10].mxu1  ;;  %v1186_v16 = vmax.f32 %v898_v1, 0.0  ;;  %v1188_v17 = vmax.f32 %v987_v3, 0.0 }
 0x1df   : > { %v902_v6 = vadd.f32 %v901_v4, %v4094_v62  ;;  %v991_v7 = vadd.f32 %v990_v5, %v4094_v62  ;;  %v903_v8 = vpop.f32.mrb[11].mxu0  ;;  %v992_v9 = vpop.f32.mrb[11].mxu1 }
 0x1e0   : > { %v904_v10 = vadd.f32 %v903_v8, %v4094_v62  ;;  %v993_v11 = vadd.f32 %v992_v9, %v4094_v62 }
 0x1e1   : > { %v1193_v14 = vmax.f32 %v902_v6, 0.0  ;;  %v1195_v15 = vmax.f32 %v991_v7, 0.0  ;;  %v4125_v7 = vld [vmem:[%s5015_s5] sm:$0xff] }
 0x1e2   : > { %v1194_v18 = vmax.f32 %v904_v10, 0.0  ;;  %v1196_v19 = vmax.f32 %v993_v11, 0.0  ;;  %v907_v20 = vpop.f32.mrb[12].mxu0  ;;  %v996_v21 = vpop.f32.mrb[12].mxu1 }
 0x1e3   : > { %v3525_v22 = vpack.c.bf16 %v1193_v14, %v1185_v12  ;;  %v3533_v23 = vpack.c.bf16 %v1195_v15, %v1187_v13  ;;  %v909_v24 = vpop.f32.mrb[13].mxu0  ;;  %v998_v25 = vpop.f32.mrb[13].mxu1  ;;  %v908_v30 = vadd.f32 %v907_v20, %v4104_v26  ;;  %v997_v31 = vadd.f32 %v996_v21, %v4104_v26 }
 0x1e4   : > { %v3523_v27 = vpack.c.bf16 %v1194_v18, %v1186_v16  ;;  %v3531_v28 = vpack.c.bf16 %v1196_v19, %v1188_v17  ;;  %v910_v32 = vadd.f32 %v909_v24, %v4104_v26  ;;  %v999_v33 = vadd.f32 %v998_v25, %v4104_v26 }
 0x1e5   : > { %v1201_v42 = vmax.f32 %v908_v30, 0.0  ;;  %v1203_v43 = vmax.f32 %v997_v31, 0.0 }
 0x1e6   : > { %v913_v34 = vpop.f32.mrb[14].mxu0  ;;  %v1002_v35 = vpop.f32.mrb[14].mxu1  ;;  %3524 = vmatprep.subr.bf16.mxu0 %v3523_v27  ;;  %3532 = vmatprep.subr.bf16.mxu1 %v3531_v28  ;;  %v1202_v46 = vmax.f32 %v910_v32, 0.0  ;;  %v1204_v47 = vmax.f32 %v999_v33, 0.0 }
 0x1e7   : > { %v914_v36 = vadd.f32 %v913_v34, %v4106_v29  ;;  %v1003_v37 = vadd.f32 %v1002_v35, %v4106_v29  ;;  %v915_v38 = vpop.f32.mrb[15].mxu0  ;;  %v1004_v39 = vpop.f32.mrb[15].mxu1  ;;  %3526 = vmatpush1.bf16.msra.mxu0 %v3525_v22  ;;  %3534 = vmatpush1.bf16.msra.mxu1 %v3533_v23  ;;  %v4137_v22 = vld [vmem:[%s5015_s5 + $0x8] sm:$0xff] }
 0x1e8   : > { %v916_v40 = vadd.f32 %v915_v38, %v4106_v29  ;;  %v1005_v41 = vadd.f32 %v1004_v39, %v4106_v29 }
 0x1e9   : > { %v1209_v44 = vmax.f32 %v914_v36, 0.0  ;;  %v1211_v45 = vmax.f32 %v1003_v37, 0.0 }
 0x1ea   : > { %v1210_v48 = vmax.f32 %v916_v40, 0.0  ;;  %v1212_v49 = vmax.f32 %v1005_v41, 0.0  ;;  %v1073_v50 = vpop.f32.mrb[16].mxu0  ;;  %v1162_v51 = vpop.f32.mrb[16].mxu1 }
 0x1eb   : > { %v3529_v52 = vpack.c.bf16 %v1209_v44, %v1201_v42  ;;  %v3537_v53 = vpack.c.bf16 %v1211_v45, %v1203_v43  ;;  %v1075_v54 = vpop.f32.mrb[17].mxu0  ;;  %v1164_v55 = vpop.f32.mrb[17].mxu1  ;;  %v1074_v59 = vadd.f32 %v1073_v50, %v4092_v57  ;;  %v1163_v60 = vadd.f32 %v1162_v51, %v4092_v57  ;;  %v1221_v51 = vld [vmem:[%s5015_s5 + $0x20] sm:$0xff] }
 0x1ec   : > { %v3527_v56 = vpack.c.bf16 %v1210_v48, %v1202_v46  ;;  %v3535_v58 = vpack.c.bf16 %v1212_v49, %v1204_v47  ;;  %v1076_v61 = vadd.f32 %v1075_v54, %v4092_v57  ;;  %v1165_v63 = vadd.f32 %v1164_v55, %v4092_v57  ;;  %v1220_v48 = vld [vmem:[%s5015_s5 + $0x18] sm:$0xff] }
 0x1ed   : > { %v1189_v9 = vmax.f32 %v1074_v59, 0.0  ;;  %v1191_v10 = vmax.f32 %v1163_v60, 0.0  ;;  %v1224_v54 = vld [vmem:[%s5015_s5 + $0x38] sm:$0xff]  ;;  %v4232_v60 = vpop.permute.xlu0 %1235 }
 0x1ee   : > { %v1079_v0 = vpop.f32.mrb[18].mxu0  ;;  %v1168_v1 = vpop.f32.mrb[18].mxu1  ;;  %3528 = vmatprep.subr.bf16.mxu0 %v3527_v56  ;;  %3536 = vmatprep.subr.bf16.mxu1 %v3535_v58  ;;  %v1190_v13 = vmax.f32 %v1076_v61, 0.0  ;;  %v1192_v14 = vmax.f32 %v1165_v63, 0.0 }
 0x1ef   : > { %v1080_v3 = vadd.f32 %v1079_v0, %v4094_v62  ;;  %v1169_v4 = vadd.f32 %v1168_v1, %v4094_v62  ;;  %v1081_v5 = vpop.f32.mrb[19].mxu0  ;;  %v1170_v6 = vpop.f32.mrb[19].mxu1  ;;  %3530 = vmatpush1.bf16.msra.mxu0 %v3529_v52  ;;  %3538 = vmatpush1.bf16.msra.mxu1 %v3537_v53  ;;  %v1222_v52 = vld [vmem:[%s5015_s5 + $0x28] sm:$0xff]  ;;  %v1223_v53 = vld [vmem:[%s5015_s5 + $0x30] sm:$0xff] }
 0x1f0   : > { %v1082_v57 = vadd.f32 %v1081_v5, %v4094_v62  ;;  %v1171_v8 = vadd.f32 %v1170_v6, %v4094_v62  ;;  %v4234_v61 = vpop.permute.xlu1 %1240 }
 0x1f1   : > { %v1197_v11 = vmax.f32 %v1080_v3, 0.0  ;;  %v1199_v12 = vmax.f32 %v1169_v4, 0.0 }
 0x1f2   : > { %v1198_v15 = vmax.f32 %v1082_v57, 0.0  ;;  %v1200_v16 = vmax.f32 %v1171_v8, 0.0  ;;  %v1085_v17 = vpop.f32.mrb[20].mxu0  ;;  %v1174_v18 = vpop.f32.mrb[20].mxu1  ;;  %3354 = vmatmul.mubr.msk.f32.vlgmr.msra.gmra.mrb[24].mxu0 %vm1273_vm3, %v4125_v7  ;;  %3362 = vmatmul.mubr.msk.f32.vlgmr.msra.gmra.mrb[24].mxu1 %vm1273_vm3, %v4125_v7 }
 0x1f3   : > { %v3541_v19 = vpack.c.bf16 %v1197_v11, %v1189_v9  ;;  %v3549_v20 = vpack.c.bf16 %v1199_v12, %v1191_v10  ;;  %v1087_v21 = vpop.f32.mrb[21].mxu0  ;;  %v1176_v62 = vpop.f32.mrb[21].mxu1  ;;  %1368 = vmatprep.mubr.f32.mxu0 %v5023_v2  ;;  %1481 = vmatprep.mubr.f32.mxu1 %v5023_v2  ;;  %v1086_v25 = vadd.f32 %v1085_v17, %v4104_v26 }
 0x1f4   : > { %v3539_v23 = vpack.c.bf16 %v1198_v15, %v1190_v13  ;;  %v3547_v24 = vpack.c.bf16 %v1200_v16, %v1192_v14  ;;  %v1175_v27 = vadd.f32 %v1174_v18, %v4104_v26  ;;  %v1088_v28 = vadd.f32 %v1087_v21, %v4104_v26 }
 0x1f5   : > { %v1177_v30 = vadd.f32 %v1176_v62, %v4104_v26  ;;  %v1219_v26 = vld [vmem:[%s5015_s5 + $0x10] sm:$0xff]  ;;  %v1205_v39 = vmax.f32 %v1086_v25, 0.0 }
 0x1f6   : > { %v1091_v31 = vpop.f32.mrb[22].mxu0  ;;  %v1180_v32 = vpop.f32.mrb[22].mxu1  ;;  %3355 = vmatmul.mubr.msk.f32.gmra.mrb[26].mxu0 %vm1273_vm3, %v4137_v22  ;;  %3363 = vmatmul.mubr.msk.f32.gmra.mrb[26].mxu1 %vm1273_vm3, %v4137_v22  ;;  %v1207_v40 = vmax.f32 %v1175_v27, 0.0  ;;  %v1206_v43 = vmax.f32 %v1088_v28, 0.0 }
 0x1f7   : > { %v1092_v33 = vadd.f32 %v1091_v31, %v4106_v29  ;;  %v1181_v34 = vadd.f32 %v1180_v32, %v4106_v29  ;;  %3540 = vmatprep.subr.bf16.mxu0 %v3539_v23  ;;  %3548 = vmatprep.subr.bf16.mxu1 %v3547_v24  ;;  %v1093_v35 = vpop.f32.mrb[23].mxu0  ;;  %v1182_v36 = vpop.f32.mrb[23].mxu1  ;;  %v1208_v44 = vmax.f32 %v1177_v30, 0.0 }
 0x1f8   : > { %v1094_v37 = vadd.f32 %v1093_v35, %v4106_v29  ;;  %v1183_v38 = vadd.f32 %v1182_v36, %v4106_v29  ;;  %3542 = vmatpush1.bf16.msra.mxu0 %v3541_v19  ;;  %3550 = vmatpush1.bf16.msra.mxu1 %v3549_v20  ;;  %v4244_v24 = vpop.permute.xlu0 %1245  ;;  %v4246_v28 = vpop.permute.xlu1 %1250 }
 0x1f9   : > { %v1213_v41 = vmax.f32 %v1092_v33, 0.0  ;;  %v1215_v42 = vmax.f32 %v1181_v34, 0.0  ;;  %1374 = vmatprep.mubr.f32.mxu0 %v5023_v2  ;;  %1487 = vmatprep.mubr.f32.mxu1 %v5023_v2 }
 0x1fa   : > { %v1214_v45 = vmax.f32 %v1094_v37, 0.0  ;;  %v1216_v46 = vmax.f32 %v1183_v38, 0.0  ;;  %3356 = vmatmul.mubr.msk.f32.gmra.mrb[28].mxu0 %vm1273_vm3, %v1219_v26  ;;  %3364 = vmatmul.mubr.msk.f32.gmra.mrb[28].mxu1 %vm1273_vm3, %v1219_v26 }
 0x1fb   : > { %v3545_v47 = vpack.c.bf16 %v1213_v41, %v1205_v39  ;;  %v3553_v29 = vpack.c.bf16 %v1215_v42, %v1207_v40  ;;  %1380 = vmatprep.mubr.f32.mxu0 %v5023_v2  ;;  %1493 = vmatprep.mubr.f32.mxu1 %v5023_v2 }
 0x1fc   : > { %v3543_v49 = vpack.c.bf16 %v1214_v45, %v1206_v43  ;;  %v3551_v50 = vpack.c.bf16 %v1216_v46, %v1208_v44 }
 0x1fe   : > { %3357 = vmatmul.mubr.msk.f32.gmra.mrb[30].mxu0 %vm1273_vm3, %v1220_v48  ;;  %3365 = vmatmul.mubr.msk.f32.gmra.mrb[30].mxu1 %vm1273_vm3, %v1220_v48 }
 0x1ff   : > { %3544 = vmatprep.subr.bf16.mxu0 %v3543_v49  ;;  %3552 = vmatprep.subr.bf16.mxu1 %v3551_v50 }
 0x200   : > { %3546 = vmatpush1.bf16.msra.mxu0 %v3545_v47  ;;  %3554 = vmatpush1.bf16.msra.mxu1 %v3553_v29 }
 0x201   : > { %1386 = vmatprep.mubr.f32.mxu0 %v5023_v2  ;;  %1499 = vmatprep.mubr.f32.mxu1 %v5023_v2 }
 0x202   : > { %3358 = vmatmul.mubr.msk.f32.gmra.mrb[32].mxu0 %vm1273_vm3, %v1221_v51  ;;  %3366 = vmatmul.mubr.msk.f32.gmra.mrb[32].mxu1 %vm1273_vm3, %v1221_v51 }
 0x203   : > { %1392 = vmatprep.mubr.f32.mxu0 %v5023_v2  ;;  %1505 = vmatprep.mubr.f32.mxu1 %v5023_v2 }
 0x206   : > { %3359 = vmatmul.mubr.msk.f32.gmra.mrb[34].mxu0 %vm1273_vm3, %v1222_v52  ;;  %3367 = vmatmul.mubr.msk.f32.gmra.mrb[34].mxu1 %vm1273_vm3, %v1222_v52 }
 0x207   : > { %1398 = vmatprep.mubr.f32.mxu0 %v5023_v2  ;;  %1511 = vmatprep.mubr.f32.mxu1 %v5023_v2 }
 0x20a   : > { %3360 = vmatmul.mubr.msk.f32.gmra.mrb[36].mxu0 %vm1273_vm3, %v1223_v53  ;;  %3368 = vmatmul.mubr.msk.f32.gmra.mrb[36].mxu1 %vm1273_vm3, %v1223_v53 }
 0x20b   : > { %1404 = vmatprep.mubr.f32.mxu0 %v5023_v2  ;;  %1517 = vmatprep.mubr.f32.mxu1 %v5023_v2 }
 0x20e   : > { %3361 = vmatmul.mubr.msk.f32.gmra.mrb[38].mxu0 %vm1273_vm3, %v1224_v54  ;;  %3369 = vmatmul.mubr.msk.f32.gmra.mrb[38].mxu1 %vm1273_vm3, %v1224_v54 }
 0x20f   : > { %1588 = vmatprep.mubr.f32.mxu0 %v5023_v2  ;;  %1701 = vmatprep.mubr.f32.mxu1 %v5023_v2 }
 0x212   : > { %3370 = vmatmul.mubr.msk.f32.vlgmr.msra.gmra.mrb[40].mxu0 %vm1273_vm3, %v4125_v7  ;;  %3378 = vmatmul.mubr.msk.f32.vlgmr.msra.gmra.mrb[40].mxu1 %vm1273_vm3, %v4125_v7 }
 0x213   : > { %1594 = vmatprep.mubr.f32.mxu0 %v5023_v2  ;;  %1707 = vmatprep.mubr.f32.mxu1 %v5023_v2 }
 0x216   : > { %3371 = vmatmul.mubr.msk.f32.gmra.mrb[42].mxu0 %vm1273_vm3, %v4137_v22  ;;  %3379 = vmatmul.mubr.msk.f32.gmra.mrb[42].mxu1 %vm1273_vm3, %v4137_v22 }
 0x217   : > { %1600 = vmatprep.mubr.f32.mxu0 %v5023_v2  ;;  %1713 = vmatprep.mubr.f32.mxu1 %v5023_v2 }
 0x21a   : > { %3372 = vmatmul.mubr.msk.f32.gmra.mrb[44].mxu0 %vm1273_vm3, %v1219_v26  ;;  %3380 = vmatmul.mubr.msk.f32.gmra.mrb[44].mxu1 %vm1273_vm3, %v1219_v26 }
 0x21b   : > { %1606 = vmatprep.mubr.f32.mxu0 %v5023_v2  ;;  %1719 = vmatprep.mubr.f32.mxu1 %v5023_v2 }
 0x21e   : > { %3373 = vmatmul.mubr.msk.f32.gmra.mrb[46].mxu0 %vm1273_vm3, %v1220_v48  ;;  %3381 = vmatmul.mubr.msk.f32.gmra.mrb[46].mxu1 %vm1273_vm3, %v1220_v48 }
 0x21f   : > { %1612 = vmatprep.mubr.f32.mxu0 %v5023_v2  ;;  %1725 = vmatprep.mubr.f32.mxu1 %v5023_v2 }
 0x222   : > { %3374 = vmatmul.mubr.msk.f32.gmra.mrb[48].mxu0 %vm1273_vm3, %v1221_v51  ;;  %3382 = vmatmul.mubr.msk.f32.gmra.mrb[48].mxu1 %vm1273_vm3, %v1221_v51 }
 0x223   : > { %1618 = vmatprep.mubr.f32.mxu0 %v5023_v2  ;;  %1731 = vmatprep.mubr.f32.mxu1 %v5023_v2 }
 0x226   : > { %3375 = vmatmul.mubr.msk.f32.gmra.mrb[50].mxu0 %vm1273_vm3, %v1222_v52  ;;  %3383 = vmatmul.mubr.msk.f32.gmra.mrb[50].mxu1 %vm1273_vm3, %v1222_v52 }
 0x227   : > { %1624 = vmatprep.mubr.f32.mxu0 %v5023_v2  ;;  %1737 = vmatprep.mubr.f32.mxu1 %v5023_v2 }
 0x22a   : > { %3376 = vmatmul.mubr.msk.f32.gmra.mrb[52].mxu0 %vm1273_vm3, %v1223_v53  ;;  %3384 = vmatmul.mubr.msk.f32.gmra.mrb[52].mxu1 %vm1273_vm3, %v1223_v53 }
 0x22b   : > { %1630 = vmatprep.mubr.f32.mxu0 %v5023_v2  ;;  %1743 = vmatprep.mubr.f32.mxu1 %v5023_v2 }
 0x22e   : > { %3377 = vmatmul.mubr.msk.f32.gmra.mrb[54].mxu0 %vm1273_vm3, %v1224_v54  ;;  %3385 = vmatmul.mubr.msk.f32.gmra.mrb[54].mxu1 %vm1273_vm3, %v1224_v54  ;;  %v4256_v54 = vpop.permute.xlu0 %1255 }
 0x22f   : > { %2039 = vmatprep.mubr.f32.mxu0 %v5023_v2  ;;  %2200 = vmatprep.mubr.f32.mxu1 %v5023_v2 }
 0x2c5   : > { %v1364_v55 = vpop.f32.mrb[24].mxu0  ;;  %v1477_v56 = vpop.f32.mrb[24].mxu1 }
 0x2c6   : > { %v1366_v58 = vpop.f32.mrb[25].mxu0  ;;  %v1479_v59 = vpop.f32.mrb[25].mxu1  ;;  %v1365_v63 = vadd.f32 %v1364_v55, %v4232_v60  ;;  %v1478_v0 = vadd.f32 %v1477_v56, %v4232_v60 }
 0x2c7   : > { %v1367_v1 = vadd.f32 %v1366_v58, %v4232_v60  ;;  %v1480_v3 = vadd.f32 %v1479_v59, %v4232_v60  ;;  %v4258_v58 = vpop.permute.xlu1 %1260 }
 0x2c8   : > { %v1750_v11 = vmax.f32 %v1365_v63, 0.0  ;;  %v1752_v12 = vmax.f32 %v1478_v0, 0.0 }
 0x2c9   : > { %v1370_v4 = vpop.f32.mrb[26].mxu0  ;;  %v1483_v5 = vpop.f32.mrb[26].mxu1  ;;  %v1751_v15 = vmax.f32 %v1367_v1, 0.0  ;;  %v1753_v16 = vmax.f32 %v1480_v3, 0.0 }
 0x2ca   : > { %v1371_v6 = vadd.f32 %v1370_v4, %v4234_v61  ;;  %v1484_v7 = vadd.f32 %v1483_v5, %v4234_v61  ;;  %v1372_v57 = vpop.f32.mrb[27].mxu0  ;;  %v1485_v8 = vpop.f32.mrb[27].mxu1 }
 0x2cb   : > { %v1373_v9 = vadd.f32 %v1372_v57, %v4234_v61  ;;  %v1486_v10 = vadd.f32 %v1485_v8, %v4234_v61 }
 0x2cc   : > { %v1758_v13 = vmax.f32 %v1371_v6, 0.0  ;;  %v1760_v14 = vmax.f32 %v1484_v7, 0.0 }
 0x2cd   : > { %v1759_v17 = vmax.f32 %v1373_v9, 0.0  ;;  %v1761_v18 = vmax.f32 %v1486_v10, 0.0  ;;  %v1376_v19 = vpop.f32.mrb[28].mxu0  ;;  %v1489_v20 = vpop.f32.mrb[28].mxu1 }
 0x2ce   : > { %v3557_v21 = vpack.c.bf16 %v1758_v13, %v1750_v11  ;;  %v3573_v62 = vpack.c.bf16 %v1760_v14, %v1752_v12  ;;  %v1378_v22 = vpop.f32.mrb[29].mxu0  ;;  %v1491_v23 = vpop.f32.mrb[29].mxu1  ;;  %v1377_v30 = vadd.f32 %v1376_v19, %v4244_v24  ;;  %v1490_v31 = vadd.f32 %v1489_v20, %v4244_v24 }
 0x2cf   : > { %v3555_v25 = vpack.c.bf16 %v1759_v17, %v1751_v15  ;;  %v3571_v27 = vpack.c.bf16 %v1761_v18, %v1753_v16  ;;  %v1379_v32 = vadd.f32 %v1378_v22, %v4244_v24  ;;  %v1492_v33 = vadd.f32 %v1491_v23, %v4244_v24  ;;  %v4268_v23 = vpop.permute.xlu0 %1265 }
 0x2d0   : > { %v1766_v41 = vmax.f32 %v1377_v30, 0.0  ;;  %v1768_v42 = vmax.f32 %v1490_v31, 0.0  ;;  %v4270_v30 = vpop.permute.xlu1 %1270 }
 0x2d1   : > { %v1382_v34 = vpop.f32.mrb[30].mxu0  ;;  %v1495_v35 = vpop.f32.mrb[30].mxu1  ;;  %3556 = vmatprep.subr.bf16.mxu0 %v3555_v25  ;;  %3572 = vmatprep.subr.bf16.mxu1 %v3571_v27  ;;  %v1767_v45 = vmax.f32 %v1379_v32, 0.0  ;;  %v1769_v46 = vmax.f32 %v1492_v33, 0.0 }
 0x2d2   : > { %v1383_v36 = vadd.f32 %v1382_v34, %v4246_v28  ;;  %v1496_v26 = vadd.f32 %v1495_v35, %v4246_v28  ;;  %v1384_v37 = vpop.f32.mrb[31].mxu0  ;;  %v1497_v38 = vpop.f32.mrb[31].mxu1  ;;  %3558 = vmatpush1.bf16.msra.mxu0 %v3557_v21  ;;  %3574 = vmatpush1.bf16.msra.mxu1 %v3573_v62 }
 0x2d3   : > { %v1385_v39 = vadd.f32 %v1384_v37, %v4246_v28  ;;  %v1498_v40 = vadd.f32 %v1497_v38, %v4246_v28 }
 0x2d4   : > { %v1774_v43 = vmax.f32 %v1383_v36, 0.0  ;;  %v1776_v44 = vmax.f32 %v1496_v26, 0.0 }
 0x2d5   : > { %v1775_v47 = vmax.f32 %v1385_v39, 0.0  ;;  %v1777_v29 = vmax.f32 %v1498_v40, 0.0  ;;  %v1388_v48 = vpop.f32.mrb[32].mxu0  ;;  %v1501_v49 = vpop.f32.mrb[32].mxu1 }
 0x2d6   : > { %v3561_v50 = vpack.c.bf16 %v1774_v43, %v1766_v41  ;;  %v3577_v51 = vpack.c.bf16 %v1776_v44, %v1768_v42  ;;  %v1390_v52 = vpop.f32.mrb[33].mxu0  ;;  %v1503_v53 = vpop.f32.mrb[33].mxu1  ;;  %v1389_v59 = vadd.f32 %v1388_v48, %v4256_v54  ;;  %v1502_v63 = vadd.f32 %v1501_v49, %v4256_v54 }
 0x2d7   : > { %v3559_v55 = vpack.c.bf16 %v1775_v47, %v1767_v45  ;;  %v3575_v56 = vpack.c.bf16 %v1777_v29, %v1769_v46  ;;  %v1391_v0 = vadd.f32 %v1390_v52, %v4256_v54  ;;  %v1504_v1 = vadd.f32 %v1503_v53, %v4256_v54 }
 0x2d8   : > { %v1782_v10 = vmax.f32 %v1389_v59, 0.0  ;;  %v1784_v11 = vmax.f32 %v1502_v63, 0.0 }
 0x2d9   : > { %v1394_v3 = vpop.f32.mrb[34].mxu0  ;;  %v1507_v4 = vpop.f32.mrb[34].mxu1  ;;  %3560 = vmatprep.subr.bf16.mxu0 %v3559_v55  ;;  %3576 = vmatprep.subr.bf16.mxu1 %v3575_v56  ;;  %v1783_v14 = vmax.f32 %v1391_v0, 0.0  ;;  %v1785_v15 = vmax.f32 %v1504_v1, 0.0 }
 0x2da   : > { %v1395_v5 = vadd.f32 %v1394_v3, %v4258_v58  ;;  %v1508_v6 = vadd.f32 %v1507_v4, %v4258_v58  ;;  %v1396_v7 = vpop.f32.mrb[35].mxu0  ;;  %v1509_v57 = vpop.f32.mrb[35].mxu1  ;;  %3562 = vmatpush1.bf16.msra.mxu0 %v3561_v50  ;;  %3578 = vmatpush1.bf16.msra.mxu1 %v3577_v51 }
 0x2db   : > { %v1397_v8 = vadd.f32 %v1396_v7, %v4258_v58  ;;  %v1510_v9 = vadd.f32 %v1509_v57, %v4258_v58 }
 0x2dc   : > { %v1790_v12 = vmax.f32 %v1395_v5, 0.0  ;;  %v1792_v13 = vmax.f32 %v1508_v6, 0.0 }
 0x2dd   : > { %v1791_v16 = vmax.f32 %v1397_v8, 0.0  ;;  %v1793_v17 = vmax.f32 %v1510_v9, 0.0  ;;  %v1400_v18 = vpop.f32.mrb[36].mxu0  ;;  %v1513_v19 = vpop.f32.mrb[36].mxu1  ;;  %v4289_v9 = vld [vmem:[%s5017_s7] sm:$0xff] }
 0x2de   : > { %v3565_v20 = vpack.c.bf16 %v1790_v12, %v1782_v10  ;;  %v3581_v21 = vpack.c.bf16 %v1792_v13, %v1784_v11  ;;  %v1402_v62 = vpop.f32.mrb[37].mxu0  ;;  %v1515_v22 = vpop.f32.mrb[37].mxu1  ;;  %v1401_v31 = vadd.f32 %v1400_v18, %v4268_v23  ;;  %v1514_v32 = vadd.f32 %v1513_v19, %v4268_v23 }
 0x2df   : > { %v3563_v25 = vpack.c.bf16 %v1791_v16, %v1783_v14  ;;  %v3579_v27 = vpack.c.bf16 %v1793_v17, %v1785_v15  ;;  %v1403_v33 = vadd.f32 %v1402_v62, %v4268_v23  ;;  %v1516_v34 = vadd.f32 %v1515_v22, %v4268_v23 }
 0x2e0   : > { %v1798_v42 = vmax.f32 %v1401_v31, 0.0  ;;  %v1800_v43 = vmax.f32 %v1514_v32, 0.0 }
 0x2e1   : > { %v1406_v35 = vpop.f32.mrb[38].mxu0  ;;  %v1519_v36 = vpop.f32.mrb[38].mxu1  ;;  %3564 = vmatprep.subr.bf16.mxu0 %v3563_v25  ;;  %3580 = vmatprep.subr.bf16.mxu1 %v3579_v27  ;;  %v1799_v46 = vmax.f32 %v1403_v33, 0.0  ;;  %v1801_v47 = vmax.f32 %v1516_v34, 0.0  ;;  %v4301_v25 = vld [vmem:[%s5017_s7 + $0x8] sm:$0xff] }
 0x2e2   : > { %v1407_v26 = vadd.f32 %v1406_v35, %v4270_v30  ;;  %v1520_v37 = vadd.f32 %v1519_v36, %v4270_v30  ;;  %v1408_v38 = vpop.f32.mrb[39].mxu0  ;;  %v1521_v39 = vpop.f32.mrb[39].mxu1  ;;  %3566 = vmatpush1.bf16.msra.mxu0 %v3565_v20  ;;  %3582 = vmatpush1.bf16.msra.mxu1 %v3581_v21 }
 0x2e3   : > { %v1409_v40 = vadd.f32 %v1408_v38, %v4270_v30  ;;  %v1522_v41 = vadd.f32 %v1521_v39, %v4270_v30 }
 0x2e4   : > { %v1806_v44 = vmax.f32 %v1407_v26, 0.0  ;;  %v1808_v45 = vmax.f32 %v1520_v37, 0.0 }
 0x2e5   : > { %v1807_v29 = vmax.f32 %v1409_v40, 0.0  ;;  %v1809_v48 = vmax.f32 %v1522_v41, 0.0  ;;  %v1590_v49 = vpop.f32.mrb[40].mxu0  ;;  %v1703_v50 = vpop.f32.mrb[40].mxu1 }
 0x2e6   : > { %v3569_v51 = vpack.c.bf16 %v1806_v44, %v1798_v42  ;;  %v3585_v52 = vpack.c.bf16 %v1808_v45, %v1800_v43  ;;  %v1592_v53 = vpop.f32.mrb[41].mxu0  ;;  %v1705_v55 = vpop.f32.mrb[41].mxu1  ;;  %v1591_v63 = vadd.f32 %v1590_v49, %v4232_v60  ;;  %v1704_v0 = vadd.f32 %v1703_v50, %v4232_v60 }
 0x2e7   : > { %v3567_v56 = vpack.c.bf16 %v1807_v29, %v1799_v46  ;;  %v3583_v59 = vpack.c.bf16 %v1809_v48, %v1801_v47  ;;  %v1593_v1 = vadd.f32 %v1592_v53, %v4232_v60  ;;  %v1706_v3 = vadd.f32 %v1705_v55, %v4232_v60 }
 0x2e8   : > { %v1754_v11 = vmax.f32 %v1591_v63, 0.0  ;;  %v1756_v12 = vmax.f32 %v1704_v0, 0.0 }
 0x2e9   : > { %v1596_v4 = vpop.f32.mrb[42].mxu0  ;;  %v1709_v5 = vpop.f32.mrb[42].mxu1  ;;  %3568 = vmatprep.subr.bf16.mxu0 %v3567_v56  ;;  %3584 = vmatprep.subr.bf16.mxu1 %v3583_v59  ;;  %v1755_v15 = vmax.f32 %v1593_v1, 0.0  ;;  %v1757_v16 = vmax.f32 %v1706_v3, 0.0  ;;  %v4331_v56 = vld [vmem:[%s5017_s7 + $0x18] sm:$0xff] }
 0x2ea   : > { %v1597_v6 = vadd.f32 %v1596_v4, %v4234_v61  ;;  %v1710_v7 = vadd.f32 %v1709_v5, %v4234_v61  ;;  %v1598_v57 = vpop.f32.mrb[43].mxu0  ;;  %v1711_v8 = vpop.f32.mrb[43].mxu1  ;;  %3570 = vmatpush1.bf16.msra.mxu0 %v3569_v51  ;;  %3586 = vmatpush1.bf16.msra.mxu1 %v3585_v52 }
 0x2eb   : > { %v1599_v60 = vadd.f32 %v1598_v57, %v4234_v61  ;;  %v1712_v10 = vadd.f32 %v1711_v8, %v4234_v61 }
 0x2ec   : > { %v1762_v13 = vmax.f32 %v1597_v6, 0.0  ;;  %v1764_v14 = vmax.f32 %v1710_v7, 0.0 }
 0x2ed   : > { %v1763_v17 = vmax.f32 %v1599_v60, 0.0  ;;  %v1765_v18 = vmax.f32 %v1712_v10, 0.0  ;;  %v1602_v19 = vpop.f32.mrb[44].mxu0  ;;  %v1715_v20 = vpop.f32.mrb[44].mxu1  ;;  %3386 = vmatmul.mubr.msk.f32.vlgmr.msra.gmra.mrb[56].mxu0 %vm1926_vm4, %v4289_v9  ;;  %3402 = vmatmul.mubr.msk.f32.vlgmr.msra.gmra.mrb[56].mxu1 %vm1926_vm4, %v4289_v9 }
 0x2ee   : > { %v3589_v21 = vpack.c.bf16 %v1762_v13, %v1754_v11  ;;  %v3605_v62 = vpack.c.bf16 %v1764_v14, %v1756_v12  ;;  %v1604_v22 = vpop.f32.mrb[45].mxu0  ;;  %v1717_v61 = vpop.f32.mrb[45].mxu1  ;;  %2045 = vmatprep.mubr.f32.mxu0 %v5023_v2  ;;  %2206 = vmatprep.mubr.f32.mxu1 %v5023_v2  ;;  %v1603_v32 = vadd.f32 %v1602_v19, %v4244_v24 }
 0x2ef   : > { %v3587_v27 = vpack.c.bf16 %v1763_v17, %v1755_v15  ;;  %v3603_v31 = vpack.c.bf16 %v1765_v18, %v1757_v16  ;;  %v1716_v33 = vadd.f32 %v1715_v20, %v4244_v24  ;;  %v1605_v34 = vadd.f32 %v1604_v22, %v4244_v24 }
 0x2f0   : > { %v1718_v35 = vadd.f32 %v1717_v61, %v4244_v24  ;;  %v4317_v24 = vld [vmem:[%s5017_s7 + $0x10] sm:$0xff]  ;;  %v1770_v43 = vmax.f32 %v1603_v32, 0.0 }
 0x2f1   : > { %v1608_v36 = vpop.f32.mrb[46].mxu0  ;;  %v1721_v26 = vpop.f32.mrb[46].mxu1  ;;  %3387 = vmatmul.mubr.msk.f32.gmra.mrb[58].mxu0 %vm1926_vm4, %v4301_v25  ;;  %3403 = vmatmul.mubr.msk.f32.gmra.mrb[58].mxu1 %vm1926_vm4, %v4301_v25  ;;  %v1772_v44 = vmax.f32 %v1716_v33, 0.0  ;;  %v1771_v47 = vmax.f32 %v1605_v34, 0.0 }
 0x2f2   : > { %v1609_v37 = vadd.f32 %v1608_v36, %v4246_v28  ;;  %v1722_v38 = vadd.f32 %v1721_v26, %v4246_v28  ;;  %3588 = vmatprep.subr.bf16.mxu0 %v3587_v27  ;;  %3604 = vmatprep.subr.bf16.mxu1 %v3603_v31  ;;  %v1610_v39 = vpop.f32.mrb[47].mxu0  ;;  %v1723_v40 = vpop.f32.mrb[47].mxu1  ;;  %v1773_v29 = vmax.f32 %v1718_v35, 0.0  ;;  %v4361_v27 = vld [vmem:[%s5017_s7 + $0x28] sm:$0xff] }
 0x2f3   : > { %v1611_v41 = vadd.f32 %v1610_v39, %v4246_v28  ;;  %v1724_v42 = vadd.f32 %v1723_v40, %v4246_v28  ;;  %3590 = vmatpush1.bf16.msra.mxu0 %v3589_v21  ;;  %3606 = vmatpush1.bf16.msra.mxu1 %v3605_v62 }
 0x2f4   : > { %v1778_v45 = vmax.f32 %v1609_v37, 0.0  ;;  %v1780_v46 = vmax.f32 %v1722_v38, 0.0  ;;  %2051 = vmatprep.mubr.f32.mxu0 %v5023_v2  ;;  %2212 = vmatprep.mubr.f32.mxu1 %v5023_v2 }
 0x2f5   : > { %v1779_v48 = vmax.f32 %v1611_v41, 0.0  ;;  %v1781_v49 = vmax.f32 %v1724_v42, 0.0  ;;  %v1614_v50 = vpop.f32.mrb[48].mxu0  ;;  %v1727_v51 = vpop.f32.mrb[48].mxu1  ;;  %3388 = vmatmul.mubr.msk.f32.gmra.mrb[60].mxu0 %vm1926_vm4, %v4317_v24  ;;  %3404 = vmatmul.mubr.msk.f32.gmra.mrb[60].mxu1 %vm1926_vm4, %v4317_v24 }
 0x2f6   : > { %v3593_v28 = vpack.c.bf16 %v1778_v45, %v1770_v43  ;;  %v3609_v52 = vpack.c.bf16 %v1780_v46, %v1772_v44  ;;  %v1616_v53 = vpop.f32.mrb[49].mxu0  ;;  %v1729_v55 = vpop.f32.mrb[49].mxu1  ;;  %2057 = vmatprep.mubr.f32.mxu0 %v5023_v2  ;;  %2218 = vmatprep.mubr.f32.mxu1 %v5023_v2  ;;  %v1615_v0 = vadd.f32 %v1614_v50, %v4256_v54 }
 0x2f7   : > { %v3591_v59 = vpack.c.bf16 %v1779_v48, %v1771_v47  ;;  %v3607_v63 = vpack.c.bf16 %v1781_v49, %v1773_v29  ;;  %v1728_v1 = vadd.f32 %v1727_v51, %v4256_v54  ;;  %v1617_v3 = vadd.f32 %v1616_v53, %v4256_v54 }
 0x2f8   : > { %v1730_v4 = vadd.f32 %v1729_v55, %v4256_v54  ;;  %v4347_v54 = vld [vmem:[%s5017_s7 + $0x20] sm:$0xff]  ;;  %v1786_v12 = vmax.f32 %v1615_v0, 0.0  ;;  %v4436_v0 = vld [vmem:[%s5017_s7 + $0x58] sm:$0xff] }
 0x2f9   : > { %v1620_v5 = vpop.f32.mrb[50].mxu0  ;;  %v1733_v6 = vpop.f32.mrb[50].mxu1  ;;  %3389 = vmatmul.mubr.msk.f32.gmra.mrb[62].mxu0 %vm1926_vm4, %v4331_v56  ;;  %3405 = vmatmul.mubr.msk.f32.gmra.mrb[62].mxu1 %vm1926_vm4, %v4331_v56  ;;  %v1788_v13 = vmax.f32 %v1728_v1, 0.0  ;;  %v1787_v16 = vmax.f32 %v1617_v3, 0.0  ;;  %v4401_v55 = vld [vmem:[%s5017_s7 + $0x40] sm:$0xff]  ;;  %v4458_v3 = vld [vmem:[%s5017_s7 + $0x68] sm:$0xff] }
 0x2fa   : > { %v1621_v7 = vadd.f32 %v1620_v5, %v4258_v58  ;;  %v1734_v57 = vadd.f32 %v1733_v6, %v4258_v58  ;;  %3592 = vmatprep.subr.bf16.mxu0 %v3591_v59  ;;  %3608 = vmatprep.subr.bf16.mxu1 %v3607_v63  ;;  %v1622_v8 = vpop.f32.mrb[51].mxu0  ;;  %v1735_v60 = vpop.f32.mrb[51].mxu1  ;;  %v1789_v17 = vmax.f32 %v1730_v4, 0.0  ;;  %v4414_v59 = vld [vmem:[%s5017_s7 + $0x48] sm:$0xff]  ;;  %v4425_v63 = vld [vmem:[%s5017_s7 + $0x50] sm:$0xff]  ;;  %v4447_v1 = vld [vmem:[%s5017_s7 + $0x60] sm:$0xff] }
 0x2fb   : > { %v1623_v10 = vadd.f32 %v1622_v8, %v4258_v58  ;;  %v1736_v11 = vadd.f32 %v1735_v60, %v4258_v58  ;;  %3594 = vmatpush1.bf16.msra.mxu0 %v3593_v28  ;;  %3610 = vmatpush1.bf16.msra.mxu1 %v3609_v52  ;;  %v4392_v28 = vld [vmem:[%s5017_s7 + $0x38] sm:$0xff]  ;;  %v4469_v4 = vld [vmem:[%s5017_s7 + $0x70] sm:$0xff]  ;;  %v3148_v60 = vld [vmem:[%s5020_s10] sm:$0xff] }
 0x2fc   : > { %v1794_v14 = vmax.f32 %v1621_v7, 0.0  ;;  %v1796_v15 = vmax.f32 %v1734_v57, 0.0  ;;  %2063 = vmatprep.mubr.f32.mxu0 %v5023_v2  ;;  %2224 = vmatprep.mubr.f32.mxu1 %v5023_v2  ;;  %v4480_v5 = vld [vmem:[%s5017_s7 + $0x78] sm:$0xff] }
 0x2fd   : > { %v1795_v18 = vmax.f32 %v1623_v10, 0.0  ;;  %v1797_v19 = vmax.f32 %v1736_v11, 0.0  ;;  %v1626_v20 = vpop.f32.mrb[52].mxu0  ;;  %v1739_v21 = vpop.f32.mrb[52].mxu1  ;;  %3390 = vmatmul.mubr.msk.f32.gmra.mrb[64].mxu0 %vm1926_vm4, %v4347_v54  ;;  %3406 = vmatmul.mubr.msk.f32.gmra.mrb[64].mxu1 %vm1926_vm4, %v4347_v54  ;;  %v5024_v10 = vmov 0.0|0.0  }
 0x2fe   : > { %v3597_v58 = vpack.c.bf16 %v1794_v14, %v1786_v12  ;;  %v3613_v62 = vpack.c.bf16 %v1796_v15, %v1788_v13  ;;  %v1628_v22 = vpop.f32.mrb[53].mxu0  ;;  %v1741_v61 = vpop.f32.mrb[53].mxu1  ;;  %2069 = vmatprep.mubr.f32.mxu0 %v5023_v2  ;;  %2230 = vmatprep.mubr.f32.mxu1 %v5023_v2  ;;  %v1627_v33 = vadd.f32 %v1626_v20, %v4268_v23  ;;  %v3150_v14 = vld [vmem:[%s5020_s10 + $0x10] sm:$0xff]  ;;  %v3151_v15 = vld [vmem:[%s5020_s10 + $0x18] sm:$0xff]  ;;  %v3152_v20 = vld [vmem:[%s5020_s10 + $0x20] sm:$0xff] }
 0x2ff   : > { %v3595_v31 = vpack.c.bf16 %v1795_v18, %v1787_v16  ;;  %v3611_v32 = vpack.c.bf16 %v1797_v19, %v1789_v17  ;;  %v1740_v34 = vadd.f32 %v1739_v21, %v4268_v23  ;;  %v1629_v35 = vadd.f32 %v1628_v22, %v4268_v23  ;;  %v3153_v21 = vld [vmem:[%s5020_s10 + $0x28] sm:$0xff] }
 0x300   : > { %v1742_v36 = vadd.f32 %v1741_v61, %v4268_v23  ;;  %v4377_v23 = vld [vmem:[%s5017_s7 + $0x30] sm:$0xff]  ;;  %v1802_v44 = vmax.f32 %v1627_v33, 0.0  ;;  %v3623_v17 = vpack.c.bf16 %v3151_v15, %v3150_v14  ;;  %v3155_v33 = vld [vmem:[%s5020_s10 + $0x38] sm:$0xff] }
 0x301   : > { %v1632_v26 = vpop.f32.mrb[54].mxu0  ;;  %v1745_v37 = vpop.f32.mrb[54].mxu1  ;;  %3391 = vmatmul.mubr.msk.f32.gmra.mrb[66].mxu0 %vm1926_vm4, %v4361_v27  ;;  %3407 = vmatmul.mubr.msk.f32.gmra.mrb[66].mxu1 %vm1926_vm4, %v4361_v27  ;;  %v1804_v45 = vmax.f32 %v1740_v34, 0.0  ;;  %v1803_v29 = vmax.f32 %v1629_v35, 0.0 }
 0x302   : > { %v1633_v38 = vadd.f32 %v1632_v26, %v4270_v30  ;;  %v1746_v39 = vadd.f32 %v1745_v37, %v4270_v30  ;;  %3596 = vmatprep.subr.bf16.mxu0 %v3595_v31  ;;  %3612 = vmatprep.subr.bf16.mxu1 %v3611_v32  ;;  %v1634_v40 = vpop.f32.mrb[55].mxu0  ;;  %v1747_v41 = vpop.f32.mrb[55].mxu1  ;;  %v1805_v48 = vmax.f32 %v1742_v36, 0.0  ;;  %v3154_v32 = vld [vmem:[%s5020_s10 + $0x30] sm:$0xff] }
 0x303   : > { %v1635_v42 = vadd.f32 %v1634_v40, %v4270_v30  ;;  %v1748_v43 = vadd.f32 %v1747_v41, %v4270_v30  ;;  %3598 = vmatpush1.bf16.msra.mxu0 %v3597_v58  ;;  %3614 = vmatpush1.bf16.msra.mxu1 %v3613_v62  ;;  %v3626_v62 = vpack.c.bf16 %v3153_v21, %v3152_v20 }
 0x304   : > { %v1810_v46 = vmax.f32 %v1633_v38, 0.0  ;;  %v1812_v47 = vmax.f32 %v1746_v39, 0.0  ;;  %2075 = vmatprep.mubr.f32.mxu0 %v5023_v2  ;;  %2236 = vmatprep.mubr.f32.mxu1 %v5023_v2  ;;  %v3629_v37 = vpack.c.bf16 %v3155_v33, %v3154_v32 }
 0x305   : > { %v1811_v49 = vmax.f32 %v1635_v42, 0.0  ;;  %v1813_v50 = vmax.f32 %v1748_v43, 0.0  ;;  %3392 = vmatmul.mubr.msk.f32.gmra.mrb[68].mxu0 %vm1926_vm4, %v4377_v23  ;;  %3408 = vmatmul.mubr.msk.f32.gmra.mrb[68].mxu1 %vm1926_vm4, %v4377_v23 }
 0x306   : > { %v3601_v30 = vpack.c.bf16 %v1810_v46, %v1802_v44  ;;  %v3617_v51 = vpack.c.bf16 %v1812_v47, %v1804_v45  ;;  %2081 = vmatprep.mubr.f32.mxu0 %v5023_v2  ;;  %2242 = vmatprep.mubr.f32.mxu1 %v5023_v2 }
 0x307   : > { %v3599_v52 = vpack.c.bf16 %v1811_v49, %v1803_v29  ;;  %v3615_v53 = vpack.c.bf16 %v1813_v50, %v1805_v48 }
 0x309   : > { %3393 = vmatmul.mubr.msk.f32.gmra.mrb[70].mxu0 %vm1926_vm4, %v4392_v28  ;;  %3409 = vmatmul.mubr.msk.f32.gmra.mrb[70].mxu1 %vm1926_vm4, %v4392_v28 }
 0x30a   : > { %3600 = vmatprep.subr.bf16.mxu0 %v3599_v52  ;;  %3616 = vmatprep.subr.bf16.mxu1 %v3615_v53 }
 0x30b   : > { %3602 = vmatpush1.bf16.msra.mxu0 %v3601_v30  ;;  %3618 = vmatpush1.bf16.msra.mxu1 %v3617_v51 }
 0x30c   : > { %2087 = vmatprep.mubr.f32.mxu0 %v5023_v2  ;;  %2248 = vmatprep.mubr.f32.mxu1 %v5023_v2 }
 0x30d   : > { %3394 = vmatmul.mubr.msk.f32.gmra.mrb[72].mxu0 %vm1926_vm4, %v4401_v55  ;;  %3410 = vmatmul.mubr.msk.f32.gmra.mrb[72].mxu1 %vm1926_vm4, %v4401_v55 }
 0x30e   : > { %2093 = vmatprep.mubr.f32.mxu0 %v5023_v2  ;;  %2254 = vmatprep.mubr.f32.mxu1 %v5023_v2 }
 0x30f   : > { %3619 = vmatprep.subr.bf16.mxu0 %v5024_v10 }
 0x311   : > { %3395 = vmatmul.mubr.msk.f32.gmra.mrb[74].mxu0 %vm1926_vm4, %v4414_v59  ;;  %3411 = vmatmul.mubr.msk.f32.gmra.mrb[74].mxu1 %vm1926_vm4, %v4414_v59 }
 0x312   : > { %2099 = vmatprep.mubr.f32.mxu0 %v5023_v2  ;;  %2260 = vmatprep.mubr.f32.mxu1 %v5023_v2 }
 0x315   : > { %3396 = vmatmul.mubr.msk.f32.gmra.mrb[76].mxu0 %vm1926_vm4, %v4425_v63  ;;  %3412 = vmatmul.mubr.msk.f32.gmra.mrb[76].mxu1 %vm1926_vm4, %v4425_v63 }
 0x316   : > { %2105 = vmatprep.mubr.f32.mxu0 %v5023_v2  ;;  %2266 = vmatprep.mubr.f32.mxu1 %v5023_v2 }
 0x319   : > { %3397 = vmatmul.mubr.msk.f32.gmra.mrb[78].mxu0 %vm1926_vm4, %v4436_v0  ;;  %3413 = vmatmul.mubr.msk.f32.gmra.mrb[78].mxu1 %vm1926_vm4, %v4436_v0 }
 0x31a   : > { %2111 = vmatprep.mubr.f32.mxu0 %v5023_v2  ;;  %2272 = vmatprep.mubr.f32.mxu1 %v5023_v2 }
 0x31d   : > { %3398 = vmatmul.mubr.msk.f32.gmra.mrb[80].mxu0 %vm1926_vm4, %v4447_v1  ;;  %3414 = vmatmul.mubr.msk.f32.gmra.mrb[80].mxu1 %vm1926_vm4, %v4447_v1 }
 0x31e   : > { %2117 = vmatprep.mubr.f32.mxu0 %v5023_v2  ;;  %2278 = vmatprep.mubr.f32.mxu1 %v5023_v2 }
 0x321   : > { %3399 = vmatmul.mubr.msk.f32.gmra.mrb[82].mxu0 %vm1926_vm4, %v4458_v3  ;;  %3415 = vmatmul.mubr.msk.f32.gmra.mrb[82].mxu1 %vm1926_vm4, %v4458_v3 }
 0x322   : > { %2123 = vmatprep.mubr.f32.mxu0 %v5023_v2  ;;  %2284 = vmatprep.mubr.f32.mxu1 %v5023_v2 }
 0x325   : > { %3400 = vmatmul.mubr.msk.f32.gmra.mrb[84].mxu0 %vm1926_vm4, %v4469_v4  ;;  %3416 = vmatmul.mubr.msk.f32.gmra.mrb[84].mxu1 %vm1926_vm4, %v4469_v4 }
 0x326   : > { %2129 = vmatprep.mubr.f32.mxu0 %v5023_v2  ;;  %2290 = vmatprep.mubr.f32.mxu1 %v5023_v2 }
 0x329   : > { %3401 = vmatmul.mubr.msk.f32.gmra.mrb[86].mxu0 %vm1926_vm4, %v4480_v5  ;;  %3417 = vmatmul.mubr.msk.f32.gmra.mrb[86].mxu1 %vm1926_vm4, %v4480_v5 }
 0x32a   : > { %2361 = vmatprep.mubr.f32.mxu0 %v5023_v2  ;;  %2522 = vmatprep.mubr.f32.mxu1 %v5023_v2 }
 0x32d   : > { %3418 = vmatmul.mubr.msk.f32.vlgmr.msra.gmra.mrb[88].mxu0 %vm1926_vm4, %v4289_v9  ;;  %3434 = vmatmul.mubr.msk.f32.vlgmr.msra.gmra.mrb[88].mxu1 %vm1926_vm4, %v4289_v9  ;;  %v4582_v9 = vpop.permute.xlu0 %1848 }
 0x32e   : > { %2367 = vmatprep.mubr.f32.mxu0 %v5023_v2  ;;  %2528 = vmatprep.mubr.f32.mxu1 %v5023_v2 }
 0x331   : > { %3419 = vmatmul.mubr.msk.f32.gmra.mrb[90].mxu0 %vm1926_vm4, %v4301_v25  ;;  %3435 = vmatmul.mubr.msk.f32.gmra.mrb[90].mxu1 %vm1926_vm4, %v4301_v25  ;;  %v4584_v25 = vpop.permute.xlu1 %1853 }
 0x332   : > { %2373 = vmatprep.mubr.f32.mxu0 %v5023_v2  ;;  %2534 = vmatprep.mubr.f32.mxu1 %v5023_v2 }
 0x335   : > { %3420 = vmatmul.mubr.msk.f32.gmra.mrb[92].mxu0 %vm1926_vm4, %v4317_v24  ;;  %3436 = vmatmul.mubr.msk.f32.gmra.mrb[92].mxu1 %vm1926_vm4, %v4317_v24  ;;  %v4586_v24 = vpop.permute.xlu0 %1858 }
 0x336   : > { %2379 = vmatprep.mubr.f32.mxu0 %v5023_v2  ;;  %2540 = vmatprep.mubr.f32.mxu1 %v5023_v2 }
 0x339   : > { %3421 = vmatmul.mubr.msk.f32.gmra.mrb[94].mxu0 %vm1926_vm4, %v4331_v56  ;;  %3437 = vmatmul.mubr.msk.f32.gmra.mrb[94].mxu1 %vm1926_vm4, %v4331_v56  ;;  %v4588_v56 = vpop.permute.xlu1 %1863  ;;  %v4590_v6 = vpop.permute.xlu0 %2765 }
 0x33a   : > { %2385 = vmatprep.mubr.f32.mxu0 %v5023_v2  ;;  %2546 = vmatprep.mubr.f32.mxu1 %v5023_v2 }
 0x33d   : > { %3422 = vmatmul.mubr.msk.f32.gmra.mrb[96].mxu0 %vm1926_vm4, %v4347_v54  ;;  %3438 = vmatmul.mubr.msk.f32.gmra.mrb[96].mxu1 %vm1926_vm4, %v4347_v54  ;;  %v4592_v7 = vpop.permute.xlu1 %2770  ;;  %v4594_v57 = vpop.permute.xlu0 %1868  ;;  %v3149_v54 = vld [vmem:[%s5020_s10 + $0x8] sm:$0xff] }
 0x33e   : > { %2391 = vmatprep.mubr.f32.mxu0 %v5023_v2  ;;  %2552 = vmatprep.mubr.f32.mxu1 %v5023_v2  ;;  %v3620_v11 = vpack.c.bf16 %v3149_v54, %v3148_v60 }
 0x340   : > { %3621 = vmatpush3.bf16.msra.mxu0 %v3620_v11 }
 0x341   : > { %3423 = vmatmul.mubr.msk.f32.gmra.mrb[98].mxu0 %vm1926_vm4, %v4361_v27  ;;  %3439 = vmatmul.mubr.msk.f32.gmra.mrb[98].mxu1 %vm1926_vm4, %v4361_v27  ;;  %v4596_v8 = vpop.permute.xlu1 %2775  ;;  %v4605_v12 = vpop.permute.xlu0 %1873 }
 0x342   : > { %2397 = vmatprep.mubr.f32.mxu0 %v5023_v2  ;;  %2558 = vmatprep.mubr.f32.mxu1 %v5023_v2 }
 0x343   : > { %3622 = vmatprep.subr.bf16.mxu0 %v5024_v10 }
 0x344   : > { %3624 = vmatpush3.bf16.msra.mxu0 %v3623_v17 }
 0x345   : > { %3424 = vmatmul.mubr.msk.f32.gmra.mrb[100].mxu0 %vm1926_vm4, %v4377_v23  ;;  %3440 = vmatmul.mubr.msk.f32.gmra.mrb[100].mxu1 %vm1926_vm4, %v4377_v23  ;;  %v4608_v13 = vpop.permute.xlu1 %2780  ;;  %v4616_v16 = vpop.permute.xlu0 %1878 }
 0x346   : > { %2403 = vmatprep.mubr.f32.mxu0 %v5023_v2  ;;  %2564 = vmatprep.mubr.f32.mxu1 %v5023_v2 }
 0x347   : > { %3625 = vmatprep.subr.bf16.mxu0 %v5024_v10 }
 0x348   : > { %3627 = vmatpush3.bf16.msra.mxu0 %v3626_v62 }
 0x349   : > { %3425 = vmatmul.mubr.msk.f32.gmra.mrb[102].mxu0 %vm1926_vm4, %v4392_v28  ;;  %3441 = vmatmul.mubr.msk.f32.gmra.mrb[102].mxu1 %vm1926_vm4, %v4392_v28  ;;  %v4618_v18 = vpop.permute.xlu1 %2785  ;;  %v4621_v19 = vpop.permute.xlu0 %1883 }
 0x34a   : > { %2409 = vmatprep.mubr.f32.mxu0 %v5023_v2  ;;  %2570 = vmatprep.mubr.f32.mxu1 %v5023_v2 }
 0x34b   : > { %3628 = vmatprep.subr.bf16.mxu0 %v5024_v10 }
 0x34c   : > { %3630 = vmatpush3.bf16.msra.mxu0 %v3629_v37 }
 0x34d   : > { %3426 = vmatmul.mubr.msk.f32.gmra.mrb[104].mxu0 %vm1926_vm4, %v4401_v55  ;;  %3442 = vmatmul.mubr.msk.f32.gmra.mrb[104].mxu1 %vm1926_vm4, %v4401_v55  ;;  %v4629_v58 = vpop.permute.xlu1 %2790  ;;  %v4632_v22 = vpop.permute.xlu0 %1888 }
 0x34e   : > { %2415 = vmatprep.mubr.f32.mxu0 %v5023_v2  ;;  %2576 = vmatprep.mubr.f32.mxu1 %v5023_v2 }
 0x34f   : > { %3631 = vmatprep.subr.bf16.mxu0 %v5024_v10 }
 0x351   : > { %3427 = vmatmul.mubr.msk.f32.gmra.mrb[106].mxu0 %vm1926_vm4, %v4414_v59  ;;  %3443 = vmatmul.mubr.msk.f32.gmra.mrb[106].mxu1 %vm1926_vm4, %v4414_v59  ;;  %v4634_v61 = vpop.permute.xlu1 %2795  ;;  %v4646_v40 = vpop.permute.xlu0 %1893 }
 0x352   : > { %2421 = vmatprep.mubr.f32.mxu0 %v5023_v2  ;;  %2582 = vmatprep.mubr.f32.mxu1 %v5023_v2 }
 0x355   : > { %3428 = vmatmul.mubr.msk.f32.gmra.mrb[108].mxu0 %vm1926_vm4, %v4425_v63  ;;  %3444 = vmatmul.mubr.msk.f32.gmra.mrb[108].mxu1 %vm1926_vm4, %v4425_v63  ;;  %v4653_v30 = vpop.permute.xlu1 %2800  ;;  %v4667_v62 = vpop.permute.xlu0 %1898 }
 0x356   : > { %2427 = vmatprep.mubr.f32.mxu0 %v5023_v2  ;;  %2588 = vmatprep.mubr.f32.mxu1 %v5023_v2 }
 0x359   : > { %3429 = vmatmul.mubr.msk.f32.gmra.mrb[110].mxu0 %vm1926_vm4, %v4436_v0  ;;  %3445 = vmatmul.mubr.msk.f32.gmra.mrb[110].mxu1 %vm1926_vm4, %v4436_v0 }
 0x35a   : > { %2433 = vmatprep.mubr.f32.mxu0 %v5023_v2  ;;  %2594 = vmatprep.mubr.f32.mxu1 %v5023_v2 }
 0x35d   : > { %3430 = vmatmul.mubr.msk.f32.gmra.mrb[112].mxu0 %vm1926_vm4, %v4447_v1  ;;  %3446 = vmatmul.mubr.msk.f32.gmra.mrb[112].mxu1 %vm1926_vm4, %v4447_v1 }
 0x35e   : > { %2439 = vmatprep.mubr.f32.mxu0 %v5023_v2  ;;  %2600 = vmatprep.mubr.f32.mxu1 %v5023_v2 }
 0x361   : > { %3431 = vmatmul.mubr.msk.f32.gmra.mrb[114].mxu0 %vm1926_vm4, %v4458_v3  ;;  %3447 = vmatmul.mubr.msk.f32.gmra.mrb[114].mxu1 %vm1926_vm4, %v4458_v3 }
 0x362   : > { %2445 = vmatprep.mubr.f32.mxu0 %v5023_v2  ;;  %2606 = vmatprep.mubr.f32.mxu1 %v5023_v2 }
 0x365   : > { %3432 = vmatmul.mubr.msk.f32.gmra.mrb[116].mxu0 %vm1926_vm4, %v4469_v4  ;;  %3448 = vmatmul.mubr.msk.f32.gmra.mrb[116].mxu1 %vm1926_vm4, %v4469_v4 }
 0x366   : > { %2451 = vmatprep.mubr.f32.mxu0 %v5023_v2  ;;  %2612 = vmatprep.mubr.f32.mxu1 %v5023_v2 }
 0x369   : > { %3433 = vmatmul.mubr.msk.f32.gmra.mrb[118].mxu0 %vm1926_vm4, %v4480_v5  ;;  %3449 = vmatmul.mubr.msk.f32.gmra.mrb[118].mxu1 %vm1926_vm4, %v4480_v5 }
 0x3c0   : > { %v2041_v27 = vpop.f32.mrb[56].mxu0  ;;  %v2202_v31 = vpop.f32.mrb[56].mxu1 }
 0x3c1   : > { %v2042_v34 = vadd.f32 %v2041_v27, %v4582_v9  ;;  %v2203_v35 = vadd.f32 %v2202_v31, %v4582_v9  ;;  %v2043_v36 = vpop.f32.mrb[57].mxu0  ;;  %v2204_v26 = vpop.f32.mrb[57].mxu1 }
 0x3c2   : > { %v2044_v38 = vadd.f32 %v2043_v36, %v4582_v9  ;;  %v2205_v39 = vadd.f32 %v2204_v26, %v4582_v9 }
 0x3c3   : > { %v2619_v41 = vmax.f32 %v2042_v34, 0.0  ;;  %v2621_v23 = vmax.f32 %v2203_v35, 0.0 }
 0x3c4   : > { %v2620_v42 = vmax.f32 %v2044_v38, 0.0  ;;  %v2622_v43 = vmax.f32 %v2205_v39, 0.0  ;;  %v2047_v44 = vpop.f32.mrb[58].mxu0  ;;  %v2208_v45 = vpop.f32.mrb[58].mxu1 }
 0x3c5   : > { %v2048_v46 = vadd.f32 %v2047_v44, %v4584_v25  ;;  %v2209_v47 = vadd.f32 %v2208_v45, %v4584_v25  ;;  %v2049_v29 = vpop.f32.mrb[59].mxu0  ;;  %v2210_v48 = vpop.f32.mrb[59].mxu1  ;;  %v2843_v51 = vmul.f32 %v4590_v6, %v2619_v41  ;;  %v2845_v28 = vmul.f32 %v4590_v6, %v2621_v23 }
 0x3c6   : > { %v2050_v49 = vadd.f32 %v2049_v29, %v4584_v25  ;;  %v2211_v50 = vadd.f32 %v2210_v48, %v4584_v25  ;;  %v2844_v55 = vmul.f32 %v4590_v6, %v2620_v42  ;;  %v2846_v59 = vmul.f32 %v4590_v6, %v2622_v43  ;;  %v4677_v48 = vpop.permute.xlu1 %2805 }
 0x3c7   : > { %v2627_v52 = vmax.f32 %v2048_v46, 0.0  ;;  %v2629_v53 = vmax.f32 %v2209_v47, 0.0 }
 0x3c8   : > { %v2628_v63 = vmax.f32 %v2050_v49, 0.0  ;;  %v2630_v0 = vmax.f32 %v2211_v50, 0.0  ;;  %v2053_v1 = vpop.f32.mrb[60].mxu0  ;;  %v2214_v3 = vpop.f32.mrb[60].mxu1 }
 0x3c9   : > { %v2851_v4 = vmul.f32 %v4592_v7, %v2627_v52  ;;  %v2853_v5 = vmul.f32 %v4592_v7, %v2629_v53  ;;  %v2054_v60 = vadd.f32 %v2053_v1, %v4586_v24  ;;  %v2215_v54 = vadd.f32 %v2214_v3, %v4586_v24  ;;  %v2055_v11 = vpop.f32.mrb[61].mxu0  ;;  %v2216_v14 = vpop.f32.mrb[61].mxu1 }
 0x3ca   : > { %v2852_v15 = vmul.f32 %v4592_v7, %v2628_v63  ;;  %v2854_v17 = vmul.f32 %v4592_v7, %v2630_v0  ;;  %v2056_v20 = vadd.f32 %v2055_v11, %v4586_v24  ;;  %v2217_v21 = vadd.f32 %v2216_v14, %v4586_v24 }
 0x3cb   : > { %v2971_v27 = vadd.f32 %v2851_v4, %v2843_v51  ;;  %v3013_v31 = vadd.f32 %v2853_v5, %v2845_v28  ;;  %v2635_v32 = vmax.f32 %v2054_v60, 0.0  ;;  %v2637_v33 = vmax.f32 %v2215_v54, 0.0 }
 0x3cc   : > { %v2992_v34 = vadd.f32 %v2852_v15, %v2844_v55  ;;  %v3034_v35 = vadd.f32 %v2854_v17, %v2846_v59  ;;  %v2636_v36 = vmax.f32 %v2056_v20, 0.0  ;;  %v2638_v26 = vmax.f32 %v2217_v21, 0.0  ;;  %v2059_v37 = vpop.f32.mrb[62].mxu0  ;;  %v2220_v38 = vpop.f32.mrb[62].mxu1 }
 0x3cd   : > { %v2859_v39 = vmul.f32 %v4596_v8, %v2635_v32  ;;  %v2861_v41 = vmul.f32 %v4596_v8, %v2637_v33  ;;  %v2060_v23 = vadd.f32 %v2059_v37, %v4588_v56  ;;  %v2221_v42 = vadd.f32 %v2220_v38, %v4588_v56  ;;  %v2061_v43 = vpop.f32.mrb[63].mxu0  ;;  %v2222_v44 = vpop.f32.mrb[63].mxu1 }
 0x3ce   : > { %v2860_v45 = vmul.f32 %v4596_v8, %v2636_v36  ;;  %v2862_v46 = vmul.f32 %v4596_v8, %v2638_v26  ;;  %v2062_v47 = vadd.f32 %v2061_v43, %v4588_v56  ;;  %v2223_v29 = vadd.f32 %v2222_v44, %v4588_v56  ;;  %v4687_v20 = vpop.permute.xlu0 %1903 }
 0x3cf   : > { %v2972_v49 = vadd.f32 %v2971_v27, %v2859_v39  ;;  %v3014_v50 = vadd.f32 %v3013_v31, %v2861_v41  ;;  %v2643_v51 = vmax.f32 %v2060_v23, 0.0  ;;  %v2645_v28 = vmax.f32 %v2221_v42, 0.0 }
 0x3d0   : > { %v2993_v52 = vadd.f32 %v2992_v34, %v2860_v45  ;;  %v3035_v53 = vadd.f32 %v3034_v35, %v2862_v46  ;;  %v2644_v55 = vmax.f32 %v2062_v47, 0.0  ;;  %v2646_v59 = vmax.f32 %v2223_v29, 0.0  ;;  %v2065_v63 = vpop.f32.mrb[64].mxu0  ;;  %v2226_v0 = vpop.f32.mrb[64].mxu1 }
 0x3d1   : > { %v2867_v1 = vmul.f32 %v4608_v13, %v2643_v51  ;;  %v2869_v3 = vmul.f32 %v4608_v13, %v2645_v28  ;;  %v2066_v4 = vadd.f32 %v2065_v63, %v4594_v57  ;;  %v2227_v5 = vadd.f32 %v2226_v0, %v4594_v57  ;;  %v2067_v60 = vpop.f32.mrb[65].mxu0  ;;  %v2228_v54 = vpop.f32.mrb[65].mxu1 }
 0x3d2   : > { %v2868_v11 = vmul.f32 %v4608_v13, %v2644_v55  ;;  %v2870_v14 = vmul.f32 %v4608_v13, %v2646_v59  ;;  %v2068_v15 = vadd.f32 %v2067_v60, %v4594_v57  ;;  %v2229_v17 = vadd.f32 %v2228_v54, %v4594_v57  ;;  %v4697_v29 = vpop.permute.xlu1 %2810 }
 0x3d3   : > { %v2973_v21 = vadd.f32 %v2972_v49, %v2867_v1  ;;  %v3015_v27 = vadd.f32 %v3014_v50, %v2869_v3  ;;  %v2651_v31 = vmax.f32 %v2066_v4, 0.0  ;;  %v2653_v32 = vmax.f32 %v2227_v5, 0.0 }
 0x3d4   : > { %v2994_v33 = vadd.f32 %v2993_v52, %v2868_v11  ;;  %v3036_v34 = vadd.f32 %v3035_v53, %v2870_v14  ;;  %v2652_v35 = vmax.f32 %v2068_v15, 0.0  ;;  %v2654_v36 = vmax.f32 %v2229_v17, 0.0  ;;  %v2071_v26 = vpop.f32.mrb[66].mxu0  ;;  %v2232_v37 = vpop.f32.mrb[66].mxu1 }
 0x3d5   : > { %v2875_v38 = vmul.f32 %v4618_v18, %v2651_v31  ;;  %v2877_v39 = vmul.f32 %v4618_v18, %v2653_v32  ;;  %v2072_v41 = vadd.f32 %v2071_v26, %v4605_v12  ;;  %v2233_v23 = vadd.f32 %v2232_v37, %v4605_v12  ;;  %v2073_v42 = vpop.f32.mrb[67].mxu0  ;;  %v2234_v43 = vpop.f32.mrb[67].mxu1 }
 0x3d6   : > { %v2876_v44 = vmul.f32 %v4618_v18, %v2652_v35  ;;  %v2878_v45 = vmul.f32 %v4618_v18, %v2654_v36  ;;  %v2074_v46 = vadd.f32 %v2073_v42, %v4605_v12  ;;  %v2235_v47 = vadd.f32 %v2234_v43, %v4605_v12 }
 0x3d7   : > { %v2974_v49 = vadd.f32 %v2973_v21, %v2875_v38  ;;  %v3016_v50 = vadd.f32 %v3015_v27, %v2877_v39  ;;  %v2659_v51 = vmax.f32 %v2072_v41, 0.0  ;;  %v2661_v28 = vmax.f32 %v2233_v23, 0.0  ;;  %v4707_v21 = vpop.permute.xlu0 %1908 }
 0x3d8   : > { %v2995_v52 = vadd.f32 %v2994_v33, %v2876_v44  ;;  %v3037_v53 = vadd.f32 %v3036_v34, %v2878_v45  ;;  %v2660_v55 = vmax.f32 %v2074_v46, 0.0  ;;  %v2662_v59 = vmax.f32 %v2235_v47, 0.0  ;;  %v2077_v63 = vpop.f32.mrb[68].mxu0  ;;  %v2238_v0 = vpop.f32.mrb[68].mxu1 }
 0x3d9   : > { %v2883_v1 = vmul.f32 %v4629_v58, %v2659_v51  ;;  %v2885_v3 = vmul.f32 %v4629_v58, %v2661_v28  ;;  %v2078_v4 = vadd.f32 %v2077_v63, %v4616_v16  ;;  %v2239_v5 = vadd.f32 %v2238_v0, %v4616_v16  ;;  %v2079_v60 = vpop.f32.mrb[69].mxu0  ;;  %v2240_v54 = vpop.f32.mrb[69].mxu1 }
 0x3da   : > { %v2884_v11 = vmul.f32 %v4629_v58, %v2660_v55  ;;  %v2886_v14 = vmul.f32 %v4629_v58, %v2662_v59  ;;  %v2080_v15 = vadd.f32 %v2079_v60, %v4616_v16  ;;  %v2241_v17 = vadd.f32 %v2240_v54, %v4616_v16 }
 0x3db   : > { %v2975_v27 = vadd.f32 %v2974_v49, %v2883_v1  ;;  %v3017_v31 = vadd.f32 %v3016_v50, %v2885_v3  ;;  %v2667_v32 = vmax.f32 %v2078_v4, 0.0  ;;  %v2669_v33 = vmax.f32 %v2239_v5, 0.0  ;;  %v4717_v50 = vpop.permute.xlu1 %2815 }
 0x3dc   : > { %v2996_v34 = vadd.f32 %v2995_v52, %v2884_v11  ;;  %v3038_v35 = vadd.f32 %v3037_v53, %v2886_v14  ;;  %v2668_v36 = vmax.f32 %v2080_v15, 0.0  ;;  %v2670_v26 = vmax.f32 %v2241_v17, 0.0  ;;  %v2083_v37 = vpop.f32.mrb[70].mxu0  ;;  %v2244_v38 = vpop.f32.mrb[70].mxu1 }
 0x3dd   : > { %v2891_v39 = vmul.f32 %v4634_v61, %v2667_v32  ;;  %v2893_v41 = vmul.f32 %v4634_v61, %v2669_v33  ;;  %v2084_v23 = vadd.f32 %v2083_v37, %v4621_v19  ;;  %v2245_v42 = vadd.f32 %v2244_v38, %v4621_v19  ;;  %v2085_v43 = vpop.f32.mrb[71].mxu0  ;;  %v2246_v44 = vpop.f32.mrb[71].mxu1 }
 0x3de   : > { %v2892_v45 = vmul.f32 %v4634_v61, %v2668_v36  ;;  %v2894_v46 = vmul.f32 %v4634_v61, %v2670_v26  ;;  %v2086_v47 = vadd.f32 %v2085_v43, %v4621_v19  ;;  %v2247_v49 = vadd.f32 %v2246_v44, %v4621_v19  ;;  %v4727_v32 = vpop.permute.xlu0 %1913 }
 0x3df   : > { %v2976_v51 = vadd.f32 %v2975_v27, %v2891_v39  ;;  %v3018_v28 = vadd.f32 %v3017_v31, %v2893_v41  ;;  %v2675_v52 = vmax.f32 %v2084_v23, 0.0  ;;  %v2677_v53 = vmax.f32 %v2245_v42, 0.0 }
 0x3e0   : > { %v2997_v55 = vadd.f32 %v2996_v34, %v2892_v45  ;;  %v3039_v59 = vadd.f32 %v3038_v35, %v2894_v46  ;;  %v2676_v63 = vmax.f32 %v2086_v47, 0.0  ;;  %v2678_v0 = vmax.f32 %v2247_v49, 0.0  ;;  %v2089_v1 = vpop.f32.mrb[72].mxu0  ;;  %v2250_v3 = vpop.f32.mrb[72].mxu1 }
 0x3e1   : > { %v2899_v4 = vmul.f32 %v4653_v30, %v2675_v52  ;;  %v2901_v5 = vmul.f32 %v4653_v30, %v2677_v53  ;;  %v2090_v60 = vadd.f32 %v2089_v1, %v4632_v22  ;;  %v2251_v54 = vadd.f32 %v2250_v3, %v4632_v22  ;;  %v2091_v11 = vpop.f32.mrb[73].mxu0  ;;  %v2252_v14 = vpop.f32.mrb[73].mxu1 }
 0x3e2   : > { %v2900_v15 = vmul.f32 %v4653_v30, %v2676_v63  ;;  %v2902_v17 = vmul.f32 %v4653_v30, %v2678_v0  ;;  %v2092_v27 = vadd.f32 %v2091_v11, %v4632_v22  ;;  %v2253_v31 = vadd.f32 %v2252_v14, %v4632_v22  ;;  %v4737_v53 = vpop.permute.xlu1 %2820 }
 0x3e3   : > { %v2977_v33 = vadd.f32 %v2976_v51, %v2899_v4  ;;  %v3019_v34 = vadd.f32 %v3018_v28, %v2901_v5  ;;  %v2683_v35 = vmax.f32 %v2090_v60, 0.0  ;;  %v2685_v36 = vmax.f32 %v2251_v54, 0.0 }
 0x3e4   : > { %v2998_v26 = vadd.f32 %v2997_v55, %v2900_v15  ;;  %v3040_v37 = vadd.f32 %v3039_v59, %v2902_v17  ;;  %v2684_v38 = vmax.f32 %v2092_v27, 0.0  ;;  %v2686_v39 = vmax.f32 %v2253_v31, 0.0  ;;  %v2095_v41 = vpop.f32.mrb[74].mxu0  ;;  %v2256_v23 = vpop.f32.mrb[74].mxu1 }
 0x3e5   : > { %v2907_v42 = vmul.f32 %v4677_v48, %v2683_v35  ;;  %v2909_v43 = vmul.f32 %v4677_v48, %v2685_v36  ;;  %v2096_v44 = vadd.f32 %v2095_v41, %v4646_v40  ;;  %v2257_v45 = vadd.f32 %v2256_v23, %v4646_v40  ;;  %v2097_v46 = vpop.f32.mrb[75].mxu0  ;;  %v2258_v47 = vpop.f32.mrb[75].mxu1 }
 0x3e6   : > { %v2908_v49 = vmul.f32 %v4677_v48, %v2684_v38  ;;  %v2910_v51 = vmul.f32 %v4677_v48, %v2686_v39  ;;  %v2098_v28 = vadd.f32 %v2097_v46, %v4646_v40  ;;  %v2259_v52 = vadd.f32 %v2258_v47, %v4646_v40 }
 0x3e7   : > { %v2978_v55 = vadd.f32 %v2977_v33, %v2907_v42  ;;  %v3020_v59 = vadd.f32 %v3019_v34, %v2909_v43  ;;  %v2691_v63 = vmax.f32 %v2096_v44, 0.0  ;;  %v2693_v0 = vmax.f32 %v2257_v45, 0.0 }
 0x3e8   : > { %v2999_v1 = vadd.f32 %v2998_v26, %v2908_v49  ;;  %v3041_v3 = vadd.f32 %v3040_v37, %v2910_v51  ;;  %v2692_v4 = vmax.f32 %v2098_v28, 0.0  ;;  %v2694_v5 = vmax.f32 %v2259_v52, 0.0  ;;  %v2101_v60 = vpop.f32.mrb[76].mxu0  ;;  %v2262_v54 = vpop.f32.mrb[76].mxu1 }
 0x3e9   : > { %v2915_v11 = vmul.f32 %v4697_v29, %v2691_v63  ;;  %v2917_v14 = vmul.f32 %v4697_v29, %v2693_v0  ;;  %v2102_v15 = vadd.f32 %v2101_v60, %v4667_v62  ;;  %v2263_v17 = vadd.f32 %v2262_v54, %v4667_v62  ;;  %v2103_v27 = vpop.f32.mrb[77].mxu0  ;;  %v2264_v31 = vpop.f32.mrb[77].mxu1 }
 0x3ea   : > { %v2916_v33 = vmul.f32 %v4697_v29, %v2692_v4  ;;  %v2918_v34 = vmul.f32 %v4697_v29, %v2694_v5  ;;  %v2104_v35 = vadd.f32 %v2103_v27, %v4667_v62  ;;  %v2265_v36 = vadd.f32 %v2264_v31, %v4667_v62  ;;  %v4747_v26 = vpop.permute.xlu0 %1918 }
 0x3eb   : > { %v2979_v37 = vadd.f32 %v2978_v55, %v2915_v11  ;;  %v3021_v38 = vadd.f32 %v3020_v59, %v2917_v14  ;;  %v2699_v39 = vmax.f32 %v2102_v15, 0.0  ;;  %v2701_v41 = vmax.f32 %v2263_v17, 0.0 }
 0x3ec   : > { %v3000_v23 = vadd.f32 %v2999_v1, %v2916_v33  ;;  %v3042_v42 = vadd.f32 %v3041_v3, %v2918_v34  ;;  %v2700_v43 = vmax.f32 %v2104_v35, 0.0  ;;  %v2702_v44 = vmax.f32 %v2265_v36, 0.0  ;;  %v2107_v45 = vpop.f32.mrb[78].mxu0  ;;  %v2268_v46 = vpop.f32.mrb[78].mxu1 }
 0x3ed   : > { %v2923_v47 = vmul.f32 %v4717_v50, %v2699_v39  ;;  %v2925_v49 = vmul.f32 %v4717_v50, %v2701_v41  ;;  %v2108_v51 = vadd.f32 %v2107_v45, %v4687_v20  ;;  %v2269_v28 = vadd.f32 %v2268_v46, %v4687_v20  ;;  %v2109_v52 = vpop.f32.mrb[79].mxu0  ;;  %v2270_v63 = vpop.f32.mrb[79].mxu1 }
 0x3ee   : > { %v2924_v55 = vmul.f32 %v4717_v50, %v2700_v43  ;;  %v2926_v59 = vmul.f32 %v4717_v50, %v2702_v44  ;;  %v2110_v0 = vadd.f32 %v2109_v52, %v4687_v20  ;;  %v2271_v1 = vadd.f32 %v2270_v63, %v4687_v20  ;;  %v4757_v3 = vpop.permute.xlu1 %2825  ;;  %v4767_v43 = vpop.permute.xlu0 %1923 }
 0x3ef   : > { %v2980_v4 = vadd.f32 %v2979_v37, %v2923_v47  ;;  %v3022_v5 = vadd.f32 %v3021_v38, %v2925_v49  ;;  %v2707_v60 = vmax.f32 %v2108_v51, 0.0  ;;  %v2709_v54 = vmax.f32 %v2269_v28, 0.0 }
 0x3f0   : > { %v3001_v11 = vadd.f32 %v3000_v23, %v2924_v55  ;;  %v3043_v14 = vadd.f32 %v3042_v42, %v2926_v59  ;;  %v2708_v15 = vmax.f32 %v2110_v0, 0.0  ;;  %v2710_v17 = vmax.f32 %v2271_v1, 0.0  ;;  %v2113_v27 = vpop.f32.mrb[80].mxu0  ;;  %v2274_v31 = vpop.f32.mrb[80].mxu1 }
 0x3f1   : > { %v2931_v33 = vmul.f32 %v4737_v53, %v2707_v60  ;;  %v2933_v34 = vmul.f32 %v4737_v53, %v2709_v54  ;;  %v2114_v35 = vadd.f32 %v2113_v27, %v4707_v21  ;;  %v2275_v36 = vadd.f32 %v2274_v31, %v4707_v21  ;;  %v2115_v39 = vpop.f32.mrb[81].mxu0  ;;  %v2276_v41 = vpop.f32.mrb[81].mxu1 }
 0x3f2   : > { %v2932_v37 = vmul.f32 %v4737_v53, %v2708_v15  ;;  %v2934_v38 = vmul.f32 %v4737_v53, %v2710_v17  ;;  %v2116_v23 = vadd.f32 %v2115_v39, %v4707_v21  ;;  %v2277_v42 = vadd.f32 %v2276_v41, %v4707_v21  ;;  %v4777_v17 = vpop.permute.xlu1 %2830 }
 0x3f3   : > { %v2981_v44 = vadd.f32 %v2980_v4, %v2931_v33  ;;  %v3023_v45 = vadd.f32 %v3022_v5, %v2933_v34  ;;  %v2715_v46 = vmax.f32 %v2114_v35, 0.0  ;;  %v2717_v47 = vmax.f32 %v2275_v36, 0.0 }
 0x3f4   : > { %v3002_v49 = vadd.f32 %v3001_v11, %v2932_v37  ;;  %v3044_v51 = vadd.f32 %v3043_v14, %v2934_v38  ;;  %v2716_v28 = vmax.f32 %v2116_v23, 0.0  ;;  %v2718_v52 = vmax.f32 %v2277_v42, 0.0  ;;  %v2119_v63 = vpop.f32.mrb[82].mxu0  ;;  %v2280_v55 = vpop.f32.mrb[82].mxu1 }
 0x3f5   : > { %v2939_v59 = vmul.f32 %v4757_v3, %v2715_v46  ;;  %v2941_v0 = vmul.f32 %v4757_v3, %v2717_v47  ;;  %v2120_v1 = vadd.f32 %v2119_v63, %v4727_v32  ;;  %v2281_v60 = vadd.f32 %v2280_v55, %v4727_v32  ;;  %v2121_v54 = vpop.f32.mrb[83].mxu0  ;;  %v2282_v15 = vpop.f32.mrb[83].mxu1 }
 0x3f6   : > { %v2940_v4 = vmul.f32 %v4757_v3, %v2716_v28  ;;  %v2942_v5 = vmul.f32 %v4757_v3, %v2718_v52  ;;  %v2122_v11 = vadd.f32 %v2121_v54, %v4727_v32  ;;  %v2283_v14 = vadd.f32 %v2282_v15, %v4727_v32  ;;  %v4787_v63 = vpop.permute.xlu0 %2835 }
 0x3f7   : > { %v2982_v27 = vadd.f32 %v2981_v44, %v2939_v59  ;;  %v3024_v31 = vadd.f32 %v3023_v45, %v2941_v0  ;;  %v2723_v33 = vmax.f32 %v2120_v1, 0.0  ;;  %v2725_v34 = vmax.f32 %v2281_v60, 0.0 }
 0x3f8   : > { %v3003_v35 = vadd.f32 %v3002_v49, %v2940_v4  ;;  %v3045_v36 = vadd.f32 %v3044_v51, %v2942_v5  ;;  %v2724_v39 = vmax.f32 %v2122_v11, 0.0  ;;  %v2726_v41 = vmax.f32 %v2283_v14, 0.0  ;;  %v2125_v37 = vpop.f32.mrb[84].mxu0  ;;  %v2286_v38 = vpop.f32.mrb[84].mxu1 }
 0x3f9   : > { %v2947_v23 = vmul.f32 %v4777_v17, %v2723_v33  ;;  %v2949_v42 = vmul.f32 %v4777_v17, %v2725_v34  ;;  %v2126_v46 = vadd.f32 %v2125_v37, %v4747_v26  ;;  %v2287_v47 = vadd.f32 %v2286_v38, %v4747_v26  ;;  %v2127_v28 = vpop.f32.mrb[85].mxu0  ;;  %v2288_v52 = vpop.f32.mrb[85].mxu1 }
 0x3fa   : > { %v2948_v44 = vmul.f32 %v4777_v17, %v2724_v39  ;;  %v2950_v45 = vmul.f32 %v4777_v17, %v2726_v41  ;;  %v2128_v49 = vadd.f32 %v2127_v28, %v4747_v26  ;;  %v2289_v51 = vadd.f32 %v2288_v52, %v4747_v26  ;;  %v4797_v38 = vpop.permute.xlu1 %2840 }
 0x3fb   : > { %v2983_v55 = vadd.f32 %v2982_v27, %v2947_v23  ;;  %v3025_v59 = vadd.f32 %v3024_v31, %v2949_v42  ;;  %v2731_v0 = vmax.f32 %v2126_v46, 0.0  ;;  %v2733_v1 = vmax.f32 %v2287_v47, 0.0  ;;  %5034 = vst [vmem:[#allocation6_spill] sm:$0xff] %v4797_v38 }
 0x3fc   : > { %v3004_v60 = vadd.f32 %v3003_v35, %v2948_v44  ;;  %v3046_v54 = vadd.f32 %v3045_v36, %v2950_v45  ;;  %v2732_v15 = vmax.f32 %v2128_v49, 0.0  ;;  %v2734_v4 = vmax.f32 %v2289_v51, 0.0  ;;  %v2131_v5 = vpop.f32.mrb[86].mxu0  ;;  %v2292_v11 = vpop.f32.mrb[86].mxu1 }
 0x3fd   : > { %v2955_v14 = vmul.f32 %v4787_v63, %v2731_v0  ;;  %v2957_v33 = vmul.f32 %v4787_v63, %v2733_v1  ;;  %v2132_v34 = vadd.f32 %v2131_v5, %v4767_v43  ;;  %v2293_v39 = vadd.f32 %v2292_v11, %v4767_v43  ;;  %v2133_v41 = vpop.f32.mrb[87].mxu0  ;;  %v2294_v37 = vpop.f32.mrb[87].mxu1 }
 0x3fe   : > { %v2956_v27 = vmul.f32 %v4787_v63, %v2732_v15  ;;  %v2958_v31 = vmul.f32 %v4787_v63, %v2734_v4  ;;  %v2134_v35 = vadd.f32 %v2133_v41, %v4767_v43  ;;  %v2295_v36 = vadd.f32 %v2294_v37, %v4767_v43 }
 0x3ff   : > { %v2984_v23 = vadd.f32 %v2983_v55, %v2955_v14  ;;  %v3026_v42 = vadd.f32 %v3025_v59, %v2957_v33  ;;  %v2739_v46 = vmax.f32 %v2132_v34, 0.0  ;;  %v2741_v47 = vmax.f32 %v2293_v39, 0.0 }
 0x400   : > { %v3005_v28 = vadd.f32 %v3004_v60, %v2956_v27  ;;  %v3047_v52 = vadd.f32 %v3046_v54, %v2958_v31  ;;  %v2740_v44 = vmax.f32 %v2134_v35, 0.0  ;;  %v2742_v45 = vmax.f32 %v2295_v36, 0.0  ;;  %v2363_v49 = vpop.f32.mrb[88].mxu0  ;;  %v2524_v51 = vpop.f32.mrb[88].mxu1 }
 0x401   : > { %v2963_v0 = vmul.f32 %v4797_v38, %v2739_v46  ;;  %v2965_v1 = vmul.f32 %v4797_v38, %v2741_v47  ;;  %v2364_v15 = vadd.f32 %v2363_v49, %v4582_v9  ;;  %v2525_v4 = vadd.f32 %v2524_v51, %v4582_v9  ;;  %v2365_v5 = vpop.f32.mrb[89].mxu0  ;;  %v2526_v11 = vpop.f32.mrb[89].mxu1 }
 0x402   : > { %v2964_v55 = vmul.f32 %v4797_v38, %v2740_v44  ;;  %v2966_v59 = vmul.f32 %v4797_v38, %v2742_v45  ;;  %v2366_v60 = vadd.f32 %v2365_v5, %v4582_v9  ;;  %v2527_v54 = vadd.f32 %v2526_v11, %v4582_v9 }
 0x403   : > { %v2985_v14 = vadd.f32 %v2984_v23, %v2963_v0  ;;  %v3027_v33 = vadd.f32 %v3026_v42, %v2965_v1  ;;  %v2623_v34 = vmax.f32 %v2364_v15, 0.0  ;;  %v2625_v39 = vmax.f32 %v2525_v4, 0.0 }
 0x404   : > { %v3006_v41 = vadd.f32 %v3005_v28, %v2964_v55  ;;  %v3048_v37 = vadd.f32 %v3047_v52, %v2966_v59  ;;  %v2624_v27 = vmax.f32 %v2366_v60, 0.0  ;;  %v2626_v31 = vmax.f32 %v2527_v54, 0.0  ;;  %v2369_v35 = vpop.f32.mrb[90].mxu0  ;;  %v2530_v36 = vpop.f32.mrb[90].mxu1 }
 0x405   : > { %v2986_v46 = vrot.slane %v2985_v14, 4  ;;  %v3028_v47 = vrot.slane %v3027_v33, 4  ;;  %v2847_v44 = vmul.f32 %v4590_v6, %v2623_v34  ;;  %v2849_v45 = vmul.f32 %v4590_v6, %v2625_v39  ;;  %v2371_v49 = vpop.f32.mrb[91].mxu0  ;;  %v2532_v51 = vpop.f32.mrb[91].mxu1 }
 0x406   : > { %v3007_v5 = vrot.slane %v3006_v41, 4  ;;  %v3049_v9 = vrot.slane %v3048_v37, 4  ;;  %v2848_v23 = vmul.f32 %v4590_v6, %v2624_v27  ;;  %v2850_v42 = vmul.f32 %v4590_v6, %v2626_v31 }
 0x407   : > { %v2987_v28 = vadd.f32 %v2986_v46, %v2985_v14  ;;  %v3029_v52 = vadd.f32 %v3028_v47, %v3027_v33  ;;  %v2370_v0 = vadd.f32 %v2369_v35, %v4584_v25  ;;  %v2531_v1 = vadd.f32 %v2530_v36, %v4584_v25 }
 0x408   : > { %v3008_v15 = vadd.f32 %v3007_v5, %v3006_v41  ;;  %v3050_v4 = vadd.f32 %v3049_v9, %v3048_v37  ;;  %v2372_v11 = vadd.f32 %v2371_v49, %v4584_v25  ;;  %v2533_v55 = vadd.f32 %v2532_v51, %v4584_v25  ;;  %v2375_v59 = vpop.f32.mrb[92].mxu0  ;;  %v2536_v60 = vpop.f32.mrb[92].mxu1 }
 0x409   : > { %v2988_v54 = vrot.slane %v2987_v28, 2  ;;  %v3030_v34 = vrot.slane %v3029_v52, 2  ;;  %v2631_v39 = vmax.f32 %v2370_v0, 0.0  ;;  %v2633_v27 = vmax.f32 %v2531_v1, 0.0  ;;  %v2377_v2 = vpop.f32.mrb[93].mxu0  ;;  %v2538_v6 = vpop.f32.mrb[93].mxu1 }
 0x40a   : > { %v3009_v14 = vrot.slane %v3008_v15, 2  ;;  %v3051_v33 = vrot.slane %v3050_v4, 2  ;;  %v2632_v31 = vmax.f32 %v2372_v11, 0.0  ;;  %v2634_v35 = vmax.f32 %v2533_v55, 0.0 }
 0x40b   : > { %v2989_v46 = vadd.f32 %v2988_v54, %v2987_v28  ;;  %v3031_v36 = vadd.f32 %v3030_v34, %v3029_v52  ;;  %v2855_v41 = vmul.f32 %v4592_v7, %v2631_v39  ;;  %v2857_v37 = vmul.f32 %v4592_v7, %v2633_v27 }
 0x40c   : > { %v3010_v47 = vadd.f32 %v3009_v14, %v3008_v15  ;;  %v3052_v25 = vadd.f32 %v3051_v33, %v3050_v4  ;;  %v2856_v49 = vmul.f32 %v4592_v7, %v2632_v31  ;;  %v2858_v51 = vmul.f32 %v4592_v7, %v2634_v35  ;;  %v2381_v5 = vpop.f32.mrb[94].mxu0  ;;  %v2542_v9 = vpop.f32.mrb[94].mxu1 }
 0x40d   : > { %v2990_v0 = vrot.slane %v2989_v46, 1  ;;  %v3032_v1 = vrot.slane %v3031_v36, 1  ;;  %v3055_v10 = vadd.f32 %v2855_v41, %v2847_v44  ;;  %v3097_v38 = vadd.f32 %v2857_v37, %v2849_v45  ;;  %v2383_v11 = vpop.f32.mrb[95].mxu0  ;;  %v2544_v55 = vpop.f32.mrb[95].mxu1 }
 0x40e   : > { %v3011_v28 = vrot.slane %v3010_v47, 1  ;;  %v3053_v52 = vrot.slane %v3052_v25, 1  ;;  %v3076_v54 = vadd.f32 %v2856_v49, %v2848_v23  ;;  %v3118_v34 = vadd.f32 %v2858_v51, %v2850_v42 }
 0x40f   : > { %v2991_v39 = vadd.f32 %v2990_v0, %v2989_v46  ;;  %v3033_v27 = vadd.f32 %v3032_v1, %v3031_v36  ;;  %v2376_v15 = vadd.f32 %v2375_v59, %v4586_v24  ;;  %v2537_v4 = vadd.f32 %v2536_v60, %v4586_v24 }
 0x410   : > { %v3012_v14 = vadd.f32 %v3011_v28, %v3010_v47  ;;  %v3054_v7 = vadd.f32 %v3053_v52, %v3052_v25  ;;  %v2378_v33 = vadd.f32 %v2377_v2, %v4586_v24  ;;  %v2539_v31 = vadd.f32 %v2538_v6, %v4586_v24  ;;  %v2387_v44 = vpop.f32.mrb[96].mxu0  ;;  %v2548_v45 = vpop.f32.mrb[96].mxu1 }
 0x411   : > { %3139 = vst [vmem:[#allocation2] sm:$0x1] %v2991_v39  ;;  %3141 = vst [vmem:[#allocation2 + $0x2] sm:$0x1] %v3033_v27  ;;  %v2639_v35 = vmax.f32 %v2376_v15, 0.0  ;;  %v2641_v41 = vmax.f32 %v2537_v4, 0.0  ;;  %v2382_v23 = vadd.f32 %v2381_v5, %v4588_v56  ;;  %v2543_v42 = vadd.f32 %v2542_v9, %v4588_v56 }
 0x412   : > { %v2389_v46 = vpop.f32.mrb[97].mxu0  ;;  %v2550_v59 = vpop.f32.mrb[97].mxu1  ;;  %3140 = vst [vmem:[#allocation2 + $0x1] sm:$0x1] %v3012_v14  ;;  %3142 = vst [vmem:[#allocation2 + $0x3] sm:$0x1] %v3054_v7  ;;  %v2384_v2 = vadd.f32 %v2383_v11, %v4588_v56  ;;  %v2545_v24 = vadd.f32 %v2544_v55, %v4588_v56 }
 0x413   : > { %v2640_v60 = vmax.f32 %v2378_v33, 0.0  ;;  %v2642_v36 = vmax.f32 %v2539_v31, 0.0  ;;  %v2863_v6 = vmul.f32 %v4596_v8, %v2639_v35  ;;  %v2865_v37 = vmul.f32 %v4596_v8, %v2641_v41 }
 0x414   : > { %v2647_v47 = vmax.f32 %v2382_v23, 0.0  ;;  %v2649_v25 = vmax.f32 %v2543_v42, 0.0  ;;  %v2648_v5 = vmax.f32 %v2384_v2, 0.0  ;;  %v2650_v9 = vmax.f32 %v2545_v24, 0.0  ;;  %v2393_v0 = vpop.f32.mrb[98].mxu0  ;;  %v2554_v1 = vpop.f32.mrb[98].mxu1 }
 0x415   : > { %v2864_v49 = vmul.f32 %v4596_v8, %v2640_v60  ;;  %v2866_v51 = vmul.f32 %v4596_v8, %v2642_v36  ;;  %v3056_v28 = vadd.f32 %v3055_v10, %v2863_v6  ;;  %v3098_v52 = vadd.f32 %v3097_v38, %v2865_v37  ;;  %v2395_v55 = vpop.f32.mrb[99].mxu0  ;;  %v2556_v39 = vpop.f32.mrb[99].mxu1 }
 0x416   : > { %v2871_v11 = vmul.f32 %v4608_v13, %v2647_v47  ;;  %v2873_v56 = vmul.f32 %v4608_v13, %v2649_v25  ;;  %v2872_v4 = vmul.f32 %v4608_v13, %v2648_v5  ;;  %v2874_v14 = vmul.f32 %v4608_v13, %v2650_v9 }
 0x417   : > { %v3077_v27 = vadd.f32 %v3076_v54, %v2864_v49  ;;  %v3119_v15 = vadd.f32 %v3118_v34, %v2866_v51  ;;  %v2388_v33 = vadd.f32 %v2387_v44, %v4594_v57  ;;  %v2549_v31 = vadd.f32 %v2548_v45, %v4594_v57 }
 0x418   : > { %v3057_v7 = vadd.f32 %v3056_v28, %v2871_v11  ;;  %v3099_v8 = vadd.f32 %v3098_v52, %v2873_v56  ;;  %v2390_v35 = vadd.f32 %v2389_v46, %v4594_v57  ;;  %v2551_v41 = vadd.f32 %v2550_v59, %v4594_v57  ;;  %v2399_v23 = vpop.f32.mrb[100].mxu0  ;;  %v2560_v42 = vpop.f32.mrb[100].mxu1 }
 0x419   : > { %v3078_v10 = vadd.f32 %v3077_v27, %v2872_v4  ;;  %v3120_v38 = vadd.f32 %v3119_v15, %v2874_v14  ;;  %v2655_v54 = vmax.f32 %v2388_v33, 0.0  ;;  %v2657_v34 = vmax.f32 %v2549_v31, 0.0  ;;  %v2401_v36 = vpop.f32.mrb[101].mxu0  ;;  %v2562_v2 = vpop.f32.mrb[101].mxu1 }
 0x41a   : > { %v2394_v60 = vadd.f32 %v2393_v0, %v4605_v12  ;;  %v2555_v13 = vadd.f32 %v2554_v1, %v4605_v12  ;;  %v2656_v24 = vmax.f32 %v2390_v35, 0.0  ;;  %v2658_v44 = vmax.f32 %v2551_v41, 0.0 }
 0x41b   : > { %v2396_v45 = vadd.f32 %v2395_v55, %v4605_v12  ;;  %v2557_v6 = vadd.f32 %v2556_v39, %v4605_v12  ;;  %v2879_v46 = vmul.f32 %v4618_v18, %v2655_v54  ;;  %v2881_v57 = vmul.f32 %v4618_v18, %v2657_v34 }
 0x41c   : > { %v2663_v59 = vmax.f32 %v2394_v60, 0.0  ;;  %v2665_v37 = vmax.f32 %v2555_v13, 0.0  ;;  %v2880_v47 = vmul.f32 %v4618_v18, %v2656_v24  ;;  %v2882_v25 = vmul.f32 %v4618_v18, %v2658_v44  ;;  %v2405_v5 = vpop.f32.mrb[102].mxu0  ;;  %v2566_v9 = vpop.f32.mrb[102].mxu1 }
 0x41d   : > { %v2664_v49 = vmax.f32 %v2396_v45, 0.0  ;;  %v2666_v51 = vmax.f32 %v2557_v6, 0.0  ;;  %v3058_v0 = vadd.f32 %v3057_v7, %v2879_v46  ;;  %v3100_v1 = vadd.f32 %v3099_v8, %v2881_v57  ;;  %v2407_v52 = vpop.f32.mrb[103].mxu0  ;;  %v2568_v11 = vpop.f32.mrb[103].mxu1 }
 0x41e   : > { %v2887_v28 = vmul.f32 %v4629_v58, %v2663_v59  ;;  %v2889_v12 = vmul.f32 %v4629_v58, %v2665_v37  ;;  %v3079_v56 = vadd.f32 %v3078_v10, %v2880_v47  ;;  %v3121_v55 = vadd.f32 %v3120_v38, %v2882_v25 }
 0x41f   : > { %v2888_v39 = vmul.f32 %v4629_v58, %v2664_v49  ;;  %v2890_v27 = vmul.f32 %v4629_v58, %v2666_v51  ;;  %v2400_v4 = vadd.f32 %v2399_v23, %v4616_v16  ;;  %v2561_v14 = vadd.f32 %v2560_v42, %v4616_v16 }
 0x420   : > { %v3059_v15 = vadd.f32 %v3058_v0, %v2887_v28  ;;  %v3101_v18 = vadd.f32 %v3100_v1, %v2889_v12  ;;  %v2402_v33 = vadd.f32 %v2401_v36, %v4616_v16  ;;  %v2563_v31 = vadd.f32 %v2562_v2, %v4616_v16  ;;  %v2411_v35 = vpop.f32.mrb[104].mxu0  ;;  %v2572_v41 = vpop.f32.mrb[104].mxu1 }
 0x421   : > { %v3080_v7 = vadd.f32 %v3079_v56, %v2888_v39  ;;  %v3122_v8 = vadd.f32 %v3121_v55, %v2890_v27  ;;  %v2671_v10 = vmax.f32 %v2400_v4, 0.0  ;;  %v2673_v38 = vmax.f32 %v2561_v14, 0.0  ;;  %v2413_v34 = vpop.f32.mrb[105].mxu0  ;;  %v2574_v60 = vpop.f32.mrb[105].mxu1 }
 0x422   : > { %v2406_v54 = vadd.f32 %v2405_v5, %v4621_v19  ;;  %v2567_v58 = vadd.f32 %v2566_v9, %v4621_v19  ;;  %v2672_v13 = vmax.f32 %v2402_v33, 0.0  ;;  %v2674_v23 = vmax.f32 %v2563_v31, 0.0 }
 0x423   : > { %v2408_v42 = vadd.f32 %v2407_v52, %v4621_v19  ;;  %v2569_v24 = vadd.f32 %v2568_v11, %v4621_v19  ;;  %v2895_v36 = vmul.f32 %v4634_v61, %v2671_v10  ;;  %v2897_v16 = vmul.f32 %v4634_v61, %v2673_v38 }
 0x424   : > { %v2679_v2 = vmax.f32 %v2406_v54, 0.0  ;;  %v2681_v44 = vmax.f32 %v2567_v58, 0.0  ;;  %v2896_v45 = vmul.f32 %v4634_v61, %v2672_v13  ;;  %v2898_v6 = vmul.f32 %v4634_v61, %v2674_v23  ;;  %v2417_v59 = vpop.f32.mrb[106].mxu0  ;;  %v2578_v37 = vpop.f32.mrb[106].mxu1 }
 0x425   : > { %v2680_v46 = vmax.f32 %v2408_v42, 0.0  ;;  %v2682_v57 = vmax.f32 %v2569_v24, 0.0  ;;  %v3060_v47 = vadd.f32 %v3059_v15, %v2895_v36  ;;  %v3102_v25 = vadd.f32 %v3101_v18, %v2897_v16  ;;  %v2419_v51 = vpop.f32.mrb[107].mxu0  ;;  %v2580_v5 = vpop.f32.mrb[107].mxu1 }
 0x426   : > { %v2903_v49 = vmul.f32 %v4653_v30, %v2679_v2  ;;  %v2905_v19 = vmul.f32 %v4653_v30, %v2681_v44  ;;  %v3081_v9 = vadd.f32 %v3080_v7, %v2896_v45  ;;  %v3123_v0 = vadd.f32 %v3122_v8, %v2898_v6 }
 0x427   : > { %v2904_v1 = vmul.f32 %v4653_v30, %v2680_v46  ;;  %v2906_v28 = vmul.f32 %v4653_v30, %v2682_v57  ;;  %v2412_v52 = vadd.f32 %v2411_v35, %v4632_v22  ;;  %v2573_v11 = vadd.f32 %v2572_v41, %v4632_v22 }
 0x428   : > { %v3061_v12 = vadd.f32 %v3060_v47, %v2903_v49  ;;  %v3103_v61 = vadd.f32 %v3102_v25, %v2905_v19  ;;  %v2414_v39 = vadd.f32 %v2413_v34, %v4632_v22  ;;  %v2575_v27 = vadd.f32 %v2574_v60, %v4632_v22  ;;  %v2423_v15 = vpop.f32.mrb[108].mxu0  ;;  %v2584_v18 = vpop.f32.mrb[108].mxu1 }
 0x429   : > { %v3082_v56 = vadd.f32 %v3081_v9, %v2904_v1  ;;  %v3124_v55 = vadd.f32 %v3123_v0, %v2906_v28  ;;  %v2687_v4 = vmax.f32 %v2412_v52, 0.0  ;;  %v2689_v14 = vmax.f32 %v2573_v11, 0.0  ;;  %v2425_v8 = vpop.f32.mrb[109].mxu0  ;;  %v2586_v33 = vpop.f32.mrb[109].mxu1 }
 0x42a   : > { %v2418_v7 = vadd.f32 %v2417_v59, %v4646_v40  ;;  %v2579_v30 = vadd.f32 %v2578_v37, %v4646_v40  ;;  %v2688_v31 = vmax.f32 %v2414_v39, 0.0  ;;  %v2690_v35 = vmax.f32 %v2575_v27, 0.0 }
 0x42b   : > { %v2420_v41 = vadd.f32 %v2419_v51, %v4646_v40  ;;  %v2581_v10 = vadd.f32 %v2580_v5, %v4646_v40  ;;  %v2911_v38 = vmul.f32 %v4677_v48, %v2687_v4  ;;  %v2913_v22 = vmul.f32 %v4677_v48, %v2689_v14 }
 0x42c   : > { %v2695_v54 = vmax.f32 %v2418_v7, 0.0  ;;  %v2697_v58 = vmax.f32 %v2579_v30, 0.0  ;;  %v2912_v34 = vmul.f32 %v4677_v48, %v2688_v31  ;;  %v2914_v60 = vmul.f32 %v4677_v48, %v2690_v35  ;;  %v2429_v42 = vpop.f32.mrb[110].mxu0  ;;  %v2590_v24 = vpop.f32.mrb[110].mxu1 }
 0x42d   : > { %v2696_v13 = vmax.f32 %v2420_v41, 0.0  ;;  %v2698_v23 = vmax.f32 %v2581_v10, 0.0  ;;  %v3062_v36 = vadd.f32 %v3061_v12, %v2911_v38  ;;  %v3104_v16 = vadd.f32 %v3103_v61, %v2913_v22  ;;  %v2431_v44 = vpop.f32.mrb[111].mxu0  ;;  %v2592_v45 = vpop.f32.mrb[111].mxu1 }
 0x42e   : > { %v2919_v2 = vmul.f32 %v4697_v29, %v2695_v54  ;;  %v2921_v40 = vmul.f32 %v4697_v29, %v2697_v58  ;;  %v3083_v6 = vadd.f32 %v3082_v56, %v2912_v34  ;;  %v3125_v46 = vadd.f32 %v3124_v55, %v2914_v60 }
 0x42f   : > { %v2920_v57 = vmul.f32 %v4697_v29, %v2696_v13  ;;  %v2922_v59 = vmul.f32 %v4697_v29, %v2698_v23  ;;  %v2424_v47 = vadd.f32 %v2423_v15, %v4667_v62  ;;  %v2585_v25 = vadd.f32 %v2584_v18, %v4667_v62 }
 0x430   : > { %v3063_v37 = vadd.f32 %v3062_v36, %v2919_v2  ;;  %v3105_v48 = vadd.f32 %v3104_v16, %v2921_v40  ;;  %v2426_v51 = vadd.f32 %v2425_v8, %v4667_v62  ;;  %v2587_v5 = vadd.f32 %v2586_v33, %v4667_v62  ;;  %v2435_v9 = vpop.f32.mrb[112].mxu0  ;;  %v2596_v0 = vpop.f32.mrb[112].mxu1 }
 0x431   : > { %v3084_v49 = vadd.f32 %v3083_v6, %v2920_v57  ;;  %v3126_v19 = vadd.f32 %v3125_v46, %v2922_v59  ;;  %v2703_v1 = vmax.f32 %v2424_v47, 0.0  ;;  %v2705_v28 = vmax.f32 %v2585_v25, 0.0  ;;  %v2437_v61 = vpop.f32.mrb[113].mxu0  ;;  %v2598_v52 = vpop.f32.mrb[113].mxu1 }
 0x432   : > { %v2430_v12 = vadd.f32 %v2429_v42, %v4687_v20  ;;  %v2591_v29 = vadd.f32 %v2590_v24, %v4687_v20  ;;  %v2704_v11 = vmax.f32 %v2426_v51, 0.0  ;;  %v2706_v56 = vmax.f32 %v2587_v5, 0.0 }
 0x433   : > { %v2432_v55 = vadd.f32 %v2431_v44, %v4687_v20  ;;  %v2593_v39 = vadd.f32 %v2592_v45, %v4687_v20  ;;  %v2927_v27 = vmul.f32 %v4717_v50, %v2703_v1  ;;  %v2929_v62 = vmul.f32 %v4717_v50, %v2705_v28 }
 0x434   : > { %v2711_v15 = vmax.f32 %v2430_v12, 0.0  ;;  %v2713_v18 = vmax.f32 %v2591_v29, 0.0  ;;  %v2928_v4 = vmul.f32 %v4717_v50, %v2704_v11  ;;  %v2930_v14 = vmul.f32 %v4717_v50, %v2706_v56  ;;  %v2441_v8 = vpop.f32.mrb[114].mxu0  ;;  %v2602_v33 = vpop.f32.mrb[114].mxu1 }
 0x435   : > { %v2712_v7 = vmax.f32 %v2432_v55, 0.0  ;;  %v2714_v30 = vmax.f32 %v2593_v39, 0.0  ;;  %v3064_v31 = vadd.f32 %v3063_v37, %v2927_v27  ;;  %v3106_v35 = vadd.f32 %v3105_v48, %v2929_v62  ;;  %v2443_v10 = vpop.f32.mrb[115].mxu0  ;;  %v2604_v38 = vpop.f32.mrb[115].mxu1 }
 0x436   : > { %v2935_v41 = vmul.f32 %v4737_v53, %v2711_v15  ;;  %v2937_v20 = vmul.f32 %v4737_v53, %v2713_v18  ;;  %v3085_v22 = vadd.f32 %v3084_v49, %v2928_v4  ;;  %v3127_v54 = vadd.f32 %v3126_v19, %v2930_v14 }
 0x437   : > { %v2936_v58 = vmul.f32 %v4737_v53, %v2712_v7  ;;  %v2938_v34 = vmul.f32 %v4737_v53, %v2714_v30  ;;  %v2436_v13 = vadd.f32 %v2435_v9, %v4707_v21  ;;  %v2597_v23 = vadd.f32 %v2596_v0, %v4707_v21 }
 0x438   : > { %v3065_v60 = vadd.f32 %v3064_v31, %v2935_v41  ;;  %v3107_v50 = vadd.f32 %v3106_v35, %v2937_v20  ;;  %v2438_v36 = vadd.f32 %v2437_v61, %v4707_v21  ;;  %v2599_v16 = vadd.f32 %v2598_v52, %v4707_v21  ;;  %v2447_v2 = vpop.f32.mrb[116].mxu0  ;;  %v2608_v40 = vpop.f32.mrb[116].mxu1 }
 0x439   : > { %v3086_v42 = vadd.f32 %v3085_v22, %v2936_v58  ;;  %v3128_v24 = vadd.f32 %v3127_v54, %v2938_v34  ;;  %v2719_v44 = vmax.f32 %v2436_v13, 0.0  ;;  %v2721_v45 = vmax.f32 %v2597_v23, 0.0  ;;  %v2449_v46 = vpop.f32.mrb[117].mxu0  ;;  %v2610_v57 = vpop.f32.mrb[117].mxu1  ;;  %v3156_v13 = vld [vmem:[%s5020_s10 + $0x40] sm:$0xff] }
 0x43a   : > { %v2442_v6 = vadd.f32 %v2441_v8, %v4727_v32  ;;  %v2603_v53 = vadd.f32 %v2602_v33, %v4727_v32  ;;  %v2720_v59 = vmax.f32 %v2438_v36, 0.0  ;;  %v2722_v37 = vmax.f32 %v2599_v16, 0.0 }
 0x43b   : > { %v2444_v48 = vadd.f32 %v2443_v10, %v4727_v32  ;;  %v2605_v47 = vadd.f32 %v2604_v38, %v4727_v32  ;;  %v2943_v25 = vmul.f32 %v4757_v3, %v2719_v44  ;;  %v2945_v21 = vmul.f32 %v4757_v3, %v2721_v45  ;;  %v3158_v45 = vld [vmem:[%s5020_s10 + $0x50] sm:$0xff] }
 0x43c   : > { %v2727_v49 = vmax.f32 %v2442_v6, 0.0  ;;  %v2729_v19 = vmax.f32 %v2603_v53, 0.0  ;;  %v2944_v51 = vmul.f32 %v4757_v3, %v2720_v59  ;;  %v2946_v5 = vmul.f32 %v4757_v3, %v2722_v37  ;;  %v2453_v1 = vpop.f32.mrb[118].mxu0  ;;  %v2614_v28 = vpop.f32.mrb[118].mxu1  ;;  %v3159_v6 = vld [vmem:[%s5020_s10 + $0x58] sm:$0xff] }
 0x43d   : > { %v2728_v9 = vmax.f32 %v2444_v48, 0.0  ;;  %v2730_v0 = vmax.f32 %v2605_v47, 0.0  ;;  %v3066_v12 = vadd.f32 %v3065_v60, %v2943_v25  ;;  %v3108_v29 = vadd.f32 %v3107_v50, %v2945_v21  ;;  %v2455_v52 = vpop.f32.mrb[119].mxu0  ;;  %v2616_v11 = vpop.f32.mrb[119].mxu1 }
 0x43e   : > { %v2951_v61 = vmul.f32 %v4777_v17, %v2727_v49  ;;  %v2953_v32 = vmul.f32 %v4777_v17, %v2729_v19  ;;  %v3087_v56 = vadd.f32 %v3086_v42, %v2944_v51  ;;  %v3129_v55 = vadd.f32 %v3128_v24, %v2946_v5  ;;  %v5035_v24 = vld [vmem:[#allocation6_spill] sm:$0xff]  ;;  %v3160_v51 = vld [vmem:[%s5020_s10 + $0x60] sm:$0xff]  ;;  %v3161_v5 = vld [vmem:[%s5020_s10 + $0x68] sm:$0xff] }
 0x43f   : > { %v2952_v39 = vmul.f32 %v4777_v17, %v2728_v9  ;;  %v2954_v27 = vmul.f32 %v4777_v17, %v2730_v0  ;;  %v2448_v15 = vadd.f32 %v2447_v2, %v4747_v26  ;;  %v2609_v18 = vadd.f32 %v2608_v40, %v4747_v26 }
 0x440   : > { %v3067_v62 = vadd.f32 %v3066_v12, %v2951_v61  ;;  %v3109_v3 = vadd.f32 %v3108_v29, %v2953_v32  ;;  %v2450_v7 = vadd.f32 %v2449_v46, %v4747_v26  ;;  %v2611_v30 = vadd.f32 %v2610_v57, %v4747_v26 }
 0x441   : > { %v3088_v4 = vadd.f32 %v3087_v56, %v2952_v39  ;;  %v3130_v14 = vadd.f32 %v3129_v55, %v2954_v27  ;;  %v2735_v8 = vmax.f32 %v2448_v15, 0.0  ;;  %v2737_v33 = vmax.f32 %v2609_v18, 0.0  ;;  %v3162_v56 = vld [vmem:[%s5020_s10 + $0x70] sm:$0xff]  ;;  %v3163_v55 = vld [vmem:[%s5020_s10 + $0x78] sm:$0xff] }
 0x442   : > { %v2454_v31 = vadd.f32 %v2453_v1, %v4767_v43  ;;  %v2615_v35 = vadd.f32 %v2614_v28, %v4767_v43  ;;  %v2736_v41 = vmax.f32 %v2450_v7, 0.0  ;;  %v2738_v17 = vmax.f32 %v2611_v30, 0.0 }
 0x443   : > { %v2456_v20 = vadd.f32 %v2455_v52, %v4767_v43  ;;  %v2617_v10 = vadd.f32 %v2616_v11, %v4767_v43  ;;  %v2959_v38 = vmul.f32 %v4787_v63, %v2735_v8  ;;  %v2961_v22 = vmul.f32 %v4787_v63, %v2737_v33  ;;  %v3157_v43 = vld [vmem:[%s5020_s10 + $0x48] sm:$0xff] }
 0x444   : > { %v2743_v54 = vmax.f32 %v2454_v31, 0.0  ;;  %v2745_v58 = vmax.f32 %v2615_v35, 0.0  ;;  %v2960_v26 = vmul.f32 %v4787_v63, %v2736_v41  ;;  %v2962_v34 = vmul.f32 %v4787_v63, %v2738_v17  ;;  %v3450_v41 = vld [vmem:[%s5021_s11] ss:$0 sm:$0xff] }
 0x445   : > { %v2744_v60 = vmax.f32 %v2456_v20, 0.0  ;;  %v2746_v50 = vmax.f32 %v2617_v10, 0.0  ;;  %v3068_v23 = vadd.f32 %v3067_v62, %v2959_v38  ;;  %v3110_v42 = vadd.f32 %v3109_v3, %v2961_v22 }
 0x446   : > { %v2967_v36 = vmul.f32 %v5035_v24, %v2743_v54  ;;  %v2969_v16 = vmul.f32 %v5035_v24, %v2745_v58  ;;  %v3089_v2 = vadd.f32 %v3088_v4, %v2960_v26  ;;  %v3131_v40 = vadd.f32 %v3130_v14, %v2962_v34 }
 0x447   : > { %v2968_v63 = vmul.f32 %v5035_v24, %v2744_v60  ;;  %v2970_v44 = vmul.f32 %v5035_v24, %v2746_v50  ;;  %v3632_v57 = vpack.c.bf16 %v3157_v43, %v3156_v13  ;;  %v3635_v25 = vpack.c.bf16 %v3159_v6, %v3158_v45 }
 0x448   : > { %v3069_v53 = vadd.f32 %v3068_v23, %v2967_v36  ;;  %v3111_v46 = vadd.f32 %v3110_v42, %v2969_v16  ;;  %v5036_v19 = vmov 0.0|0.0   ;;  %v5037_v9 = vmov 0.0  }
 0x449   : > { %v3090_v59 = vadd.f32 %v3089_v2, %v2968_v63  ;;  %v3132_v37 = vadd.f32 %v3131_v40, %v2970_v44  ;;  %3633 = vmatpush3.bf16.msra.mxu0 %v3632_v57  ;;  %3504 = vmatprep.mubr.msk.f32.mxu0 %vm3759_vm5, %v5037_v9  ;;  %v3638_v32 = vpack.c.bf16 %v3161_v5, %v3160_v51 }
 0x44a   : > { %v3070_v48 = vrot.slane %v3069_v53, 4  ;;  %v3112_v47 = vrot.slane %v3111_v46, 4  ;;  %3634 = vmatprep.subr.bf16.mxu0 %v5036_v19  ;;  %v3641_v4 = vpack.c.bf16 %v3163_v55, %v3162_v56 }
 0x44b   : > { %v3091_v21 = vrot.slane %v3090_v59, 4  ;;  %v3133_v49 = vrot.slane %v3132_v37, 4 }
 0x44c   : > { %v3071_v0 = vadd.f32 %v3070_v48, %v3069_v53  ;;  %v3113_v1 = vadd.f32 %v3112_v47, %v3111_v46 }
 0x44d   : > { %v3092_v28 = vadd.f32 %v3091_v21, %v3090_v59  ;;  %v3134_v12 = vadd.f32 %v3133_v49, %v3132_v37  ;;  %3636 = vmatpush3.bf16.msra.mxu0 %v3635_v25 }
 0x44e   : > { %v3072_v29 = vrot.slane %v3071_v0, 2  ;;  %v3114_v61 = vrot.slane %v3113_v1, 2  ;;  %3637 = vmatprep.subr.bf16.mxu0 %v5036_v19 }
 0x44f   : > { %v3093_v52 = vrot.slane %v3092_v28, 2  ;;  %v3135_v11 = vrot.slane %v3134_v12, 2 }
 0x450   : > { %v3073_v39 = vadd.f32 %v3072_v29, %v3071_v0  ;;  %v3115_v27 = vadd.f32 %v3114_v61, %v3113_v1 }
 0x451   : > { %v3094_v62 = vadd.f32 %v3093_v52, %v3092_v28  ;;  %v3136_v3 = vadd.f32 %v3135_v11, %v3134_v12  ;;  %3639 = vmatpush3.bf16.msra.mxu0 %v3638_v32 }
 0x452   : > { %v3074_v15 = vrot.slane %v3073_v39, 1  ;;  %v3116_v18 = vrot.slane %v3115_v27, 1  ;;  %3640 = vmatprep.subr.bf16.mxu0 %v5036_v19 }
 0x453   : > { %v3095_v14 = vrot.slane %v3094_v62, 1  ;;  %v3137_v7 = vrot.slane %v3136_v3, 1 }
 0x454   : > { %v3075_v30 = vadd.f32 %v3074_v15, %v3073_v39  ;;  %v3117_v8 = vadd.f32 %v3116_v18, %v3115_v27 }
 0x455   : > { %v3096_v33 = vadd.f32 %v3095_v14, %v3094_v62  ;;  %v3138_v31 = vadd.f32 %v3137_v7, %v3136_v3  ;;  %3642 = vmatpush3.bf16.msra.mxu0 %v3641_v4 }
 0x456   : > { %3143 = vst [vmem:[#allocation2 + $0x4] sm:$0x1] %v3075_v30  ;;  %3145 = vst [vmem:[#allocation2 + $0x6] sm:$0x1] %v3117_v8 }
 0x457   : > { %3144 = vst [vmem:[#allocation2 + $0x5] sm:$0x1] %v3096_v33  ;;  %3146 = vst [vmem:[#allocation2 + $0x7] sm:$0x1] %v3138_v31 }
 0x45e   : > { %v3147_v35 = vld [vmem:[#allocation2] sm:$0xff] }
 0x45f   : > { %3505 = vmatmul.mubr.f32.vlgmr.msra.gmra.mrb[120].mxu0 %v3147_v35 }
 0x532   : > { %v3237_v17 = vpop.f32.mrb[120].mxu0 }
 0x533   : > { %v3238_v20 = vadd.f32 %v3450_v41, %v3237_v17  ;;  %v3506_v10 = vpop.f32.mrb[121].mxu0 }
 0x535   : > { %3241 = vst.msk [vmem:[%s407_s26] sm:$0xff] %vm1273_vm3, %v3238_v20 }
 0x536   : > { %3705 = shalt.err (!%p3702_p3)
}
 0x537   : > { %s3706_s0 = scalar_lea.hbm %s4967_s16, 128  ;;  %s3710_s29 = scalar_lea.hbm %s5022_s12, 256 }
 0x538   : > { %p3707_p4 = scmp.ne.s32.totalorder %s4967_s16, %s3706_s0  ;;  %p3711_p9 = scmp.lt.u32.totalorder %s4967_s16, %s5022_s12 }
 0x539   : > { %p3712_p10 = scmp.lt.u32.totalorder %s3710_s29, %s3706_s0  ;;  %p3714_p12 = scmp.lt.u32.totalorder %s3706_s0, %s4967_s16 }
 0x53a   : > { %p3708_p7 = pnand %p3707_p4, %p3864_p5 }
 0x53b   : > { %p3713_p11 = por %p3712_p10, %p3711_p9 }
 0x53c   : > { %p3709_p8 = pneg %p3708_p7 }
 0x53d   : > { %p3715_p13 = por %p3714_p12, %p3713_p11 }
 0x53f   : > { %p3716_p0 = pnand %p3715_p13, %p3709_p8 }
 0x541   : > { %3719 = shalt.err (!%p3716_p0)
}
 0x542   : > { %3643 = dma.vmem_to_hbm [thread:$0]  (%p3864_p5), %s4969_s28, 128, %s4967_s16, %s3243_s18  }
 0x543 PF: > { %p3649_p1 = scmp.ge.s32.totalorder %s3754_s24, 2  ;;  %s3268_s1 = sand.u32 1, %s3742_s21  }
 0x544   : > { %s3269_s19 = scalar_lea.sflag [#allocation4], %s3268_s1 }
 0x545   : > { %p3646_p2 = pnand %p3649_p1, %p3868_p6 }
 0x547   : > { %3737 = dma.done.wait (!%p3646_p2), %s3269_s19, 128  }
 0x548   : > { %3739 = vsyncadd (!%p3646_p2), %s3269_s19, 4294967168  ;;  %p22_p3 = scmp.ge.s32.totalorder %s3851_s27, 4   ;;  %s5038_s21 = smov %s3746_s22 }
 0x549   : > { %s5039_s22 = smov %s3750_s23  ;;  %s5040_s23 = smov %s3862_s30 }
 0x54a   : > { %s5041_s24 = smov %s3851_s27  ;;  %24 = sbr.rel (!%p22_p3) target bundleno = 6 (0x6), region = 103 }
 0x551   :  { %3274 = vsyncpa [#allocation4], 1 }
 0x552   :  { %3276 = vsyncpa [#allocation4 + $0x1], 1 }

</bundles_post_ra>
